<compile_context>
chip_gen: v5e
topology: v5e:2x2
jax: 0.10.0
libtpu: 0.0.40
codegen_flags: <defaults>
</compile_context>

<pallas_src>
import functools
import math

import jax
import jax.numpy as jnp
from jax import lax
from jax.experimental import pallas as pl
from jax.experimental.pallas import tpu as pltpu

# ---- small demo config (mirrors Config but scaled down) ----
D_MODEL = 32
N_HEADS = 4
D_HEAD = 8
D_MLP = 64
N_LAYERS = 2
N_CTX = 16
D_VOCAB = 64
V_PAD = 128          # lane-dense logits store; sliced back to D_VOCAB in the wrapper
QKV_PAD = 128        # fused QKV matmul output padded to one full lane tile
EPS = 1e-5
INIT_RANGE = 0.02
IGNORE = -100000.0   # only used by the pure-JAX reference


def _gelu_new(x):
    # gelu_new from GPT-2: 0.5*x*(1+tanh(sqrt(2/pi)*(x+0.044715*x^3)))
    return 0.5 * x * (1.0 + jnp.tanh(
        jnp.sqrt(2.0 / jnp.pi) * (x + 0.044715 * x * x * x)))


def _layernorm(x, w, b):
    # x: (R, D); w, b: (1, D). rsqrt -> EUP slot instead of sqrt + divide on the VALU.
    mu = jnp.mean(x, axis=-1, keepdims=True)
    xc = x - mu
    var = jnp.mean(xc * xc, axis=-1, keepdims=True)
    return xc * lax.rsqrt(var + EPS) * w + b


# -------------- fused Pallas kernel: full forward for a block of BB sequences --------------
def fused_forward_kernel(resid_ref,
                         wqkv_ref, wo_ref, win_ref, wout_ref,
                         b_ref, ln_ref, lnf_ref, wu_ref, bu_ref,
                         out_ref,
                         *, n_layers, n_heads, d_head):
    BB, S, D = resid_ref.shape
    HD = n_heads * d_head
    M = win_ref.shape[2]
    R = BB * S

    # residual stream for the whole block, flattened to rows for every row-wise matmul
    x = resid_ref[...].reshape(R, D)                       # (R, D) f32

    # causal keep-mask built once; applied AFTER exp (scores bounded at this scale),
    # so no IGNORE constant and no per-row max reduce are needed.
    row = lax.broadcasted_iota(jnp.int32, (S, S), 0)
    col = lax.broadcasted_iota(jnp.int32, (S, S), 1)
    keep = (col <= row).astype(jnp.float32)[None, :, :]    # (1, S, S)

    for l in range(n_layers):                              # static, fully unrolled (L=2)
        ln_l = ln_ref[l]                                   # (4, D): ln1_w, ln1_b, ln2_w, ln2_b
        b_l = b_ref[l]                                     # (4, 128) lane-aligned bias rows

        # --- ln1 + fused QKV projection (bf16 operands, f32 accumulation) ---
        nx = _layernorm(x, ln_l[0:1, :], ln_l[1:2, :]).astype(jnp.bfloat16)
        qkv = jnp.dot(nx, wqkv_ref[l], preferred_element_type=jnp.float32) \
            + b_l[0:1, :]                                  # (R, 128): q|k|v|pad columns

        attn_rows = []
        for bb in range(BB):                               # static per-sequence loop
            r0 = bb * S
            qkv_b = qkv[r0:r0 + S, 0:3 * HD]               # (S, 3*HD), lane slice from 0
            # one reshape + one transpose instead of per-head slice/stack:
            hsd = jnp.transpose(qkv_b.reshape(S, 3 * n_heads, d_head), (1, 0, 2))
            qh = hsd[0:n_heads]                            # (H, S, Dh) — 1/sqrt(Dh) pre-folded
            kh = hsd[n_heads:2 * n_heads]
            vh = hsd[2 * n_heads:3 * n_heads]

            s = jnp.einsum('hqd,hkd->hqk', qh, kh,
                           preferred_element_type=jnp.float32)      # (H, S, S)
            p = jnp.exp(s) * keep
            p = p * pl.reciprocal(jnp.sum(p, axis=-1, keepdims=True), approx=True)
            z = jnp.einsum('hqk,hkd->hqd', p, vh,
                           preferred_element_type=jnp.float32)      # (H, S, Dh)

            # head-batched output projection + cheap sum over heads (no lane concat)
            zo = jnp.einsum('hqd,hdm->hqm', z.astype(jnp.bfloat16), wo_ref[l],
                            preferred_element_type=jnp.float32)     # (H, S, D)
            attn_rows.append(jnp.sum(zo, axis=0))                   # (S, D)

        attn_out = attn_rows[0] if BB == 1 else jnp.concatenate(attn_rows, axis=0)
        resid_mid = x + attn_out + b_l[1:2, :D]

        # --- ln2 + MLP ---
        nm = _layernorm(resid_mid, ln_l[2:3, :], ln_l[3:4, :]).astype(jnp.bfloat16)
        pre = jnp.dot(nm, win_ref[l], preferred_element_type=jnp.float32) \
            + b_l[2:3, :M]
        post = _gelu_new(pre).astype(jnp.bfloat16)
        mlp_out = jnp.dot(post, wout_ref[l], preferred_element_type=jnp.float32) \
            + b_l[3:4, :D]

        x = resid_mid + mlp_out

    # --- final LN + unembed (vocab padded to 128 lanes -> unmasked, lane-dense store) ---
    nf = _layernorm(x, lnf_ref[0:1, :], lnf_ref[1:2, :]).astype(jnp.bfloat16)
    logits = jnp.dot(nf, wu_ref[...], preferred_element_type=jnp.float32) + bu_ref[...]
    out_ref[...] = logits.reshape(BB, S, logits.shape[-1])


# ---------------- wrapper ----------------
def _const_index_map(ndim):
    zeros = (0,) * ndim
    return lambda g: zeros


def demo_transformer_forward(tokens, params):
    B, S = tokens.shape
    # TODO(synk): token-embedding gather stays in plain JAX (no clean tiled BlockSpec
    # gather at this scale); everything after the embed+posembed sum is one fused kernel.
    resid = params["W_E"][tokens] + params["W_pos"][:S][None, :, :]

    pk = params["packed"]
    weight_args = [pk["w_qkv"], pk["w_o"], pk["w_in"], pk["w_out"],
                   pk["b_all"], pk["ln_all"], pk["lnf_wb"],
                   pk["W_U_pad"], pk["b_U_pad"]]

    # 2 parallel grid steps over batch halves = one per TensorCore on v7x; on the
    # single-TensorCore v5e/v6e the second step is a serial ~0.35us iteration (cheap).
    grid_steps = 2 if (B >= 2 and B % 2 == 0) else 1
    BB = B // grid_steps

    in_specs = [pl.BlockSpec((BB, S, D_MODEL), lambda g: (g, 0, 0))]
    # Constant-index weight blocks: not re-DMA'd across grid steps (tiny at demo scale).
    in_specs += [pl.BlockSpec(w.shape, _const_index_map(w.ndim)) for w in weight_args]

    kernel = functools.partial(fused_forward_kernel, n_layers=N_LAYERS,
                               n_heads=N_HEADS, d_head=D_HEAD)

    logits_pad = pl.pallas_call(
        kernel,
        out_shape=jax.ShapeDtypeStruct((B, S, V_PAD), jnp.float32),
        grid_spec=pltpu.PrefetchScalarGridSpec(
            num_scalar_prefetch=0,
            grid=(grid_steps,),
            in_specs=in_specs,
            out_specs=pl.BlockSpec((BB, S, V_PAD), lambda g: (g, 0, 0)),
        ),
        compiler_params=pltpu.CompilerParams(dimension_semantics=("parallel",)),
    )(resid, *weight_args)

    return logits_pad[:, :, :D_VOCAB]


# ---------------- deterministic parameter construction ----------------
def make_params(key):
    def normal(k, shape):
        return (INIT_RANGE * jax.random.normal(k, shape)).astype(jnp.float32)

    keys = jax.random.split(key, 4 + 8 * N_LAYERS)
    ki = iter(range(len(keys)))

    params = {
        "W_E": normal(keys[next(ki)], (D_VOCAB, D_MODEL)),
        "W_pos": normal(keys[next(ki)], (N_CTX, D_MODEL)),
        "W_U": normal(keys[next(ki)], (D_MODEL, D_VOCAB)),
        "b_U": jnp.zeros((D_VOCAB,), jnp.float32),
        "lnf_w": jnp.ones((D_MODEL,), jnp.float32),
        "lnf_b": jnp.zeros((D_MODEL,), jnp.float32),
        "blocks": [],
    }
    _ = keys[next(ki)]  # keep split count stable

    for _layer in range(N_LAYERS):
        W_Q = normal(keys[next(ki)], (N_HEADS, D_MODEL, D_HEAD))
        W_K = normal(keys[next(ki)], (N_HEADS, D_MODEL, D_HEAD))
        W_V = normal(keys[next(ki)], (N_HEADS, D_MODEL, D_HEAD))
        W_O = normal(keys[next(ki)], (N_HEADS, D_HEAD, D_MODEL))
        W_in = normal(keys[next(ki)], (D_MODEL, D_MLP))
        W_out = normal(keys[next(ki)], (D_MLP, D_MODEL))
        _ = keys[next(ki)], keys[next(ki)]  # spare

        params["blocks"].append({
            "W_Q": W_Q, "W_K": W_K, "W_V": W_V, "W_O": W_O,
            "b_Q": jnp.zeros((N_HEADS, D_HEAD), jnp.float32),
            "b_K": jnp.zeros((N_HEADS, D_HEAD), jnp.float32),
            "b_V": jnp.zeros((N_HEADS, D_HEAD), jnp.float32),
            "b_O": jnp.zeros((D_MODEL,), jnp.float32),
            "W_in": W_in, "W_out": W_out,
            "b_in": jnp.zeros((D_MLP,), jnp.float32),
            "b_out": jnp.zeros((D_MODEL,), jnp.float32),
            "ln1_w": jnp.ones((D_MODEL,), jnp.float32),
            "ln1_b": jnp.zeros((D_MODEL,), jnp.float32),
            "ln2_w": jnp.ones((D_MODEL,), jnp.float32),
            "ln2_b": jnp.zeros((D_MODEL,), jnp.float32),
        })

    # ---- packed / stacked forms consumed by the single fused Pallas kernel ----
    inv_sqrt_dh = 1.0 / math.sqrt(D_HEAD)
    HD = N_HEADS * D_HEAD

    def pad_lanes(v, width):
        return jnp.pad(v, (0, width - v.shape[0]))

    w_qkv, w_o, w_in_l, w_out_l, b_all, ln_all = [], [], [], [], [], []
    for blk in params["blocks"]:
        # 1/sqrt(d_head) folded into the Q columns (and b_Q) at pack time.
        wq = jnp.transpose(blk["W_Q"] * inv_sqrt_dh, (1, 0, 2)).reshape(D_MODEL, HD)
        wk = jnp.transpose(blk["W_K"], (1, 0, 2)).reshape(D_MODEL, HD)
        wv = jnp.transpose(blk["W_V"], (1, 0, 2)).reshape(D_MODEL, HD)
        wqkv = jnp.concatenate([wq, wk, wv], axis=1)                      # (D, 96)
        wqkv = jnp.pad(wqkv, ((0, 0), (0, QKV_PAD - 3 * HD)))             # (D, 128)
        w_qkv.append(wqkv.astype(jnp.bfloat16))
        w_o.append(blk["W_O"].astype(jnp.bfloat16))                       # (H, Dh, D)
        w_in_l.append(blk["W_in"].astype(jnp.bfloat16))
        w_out_l.append(blk["W_out"].astype(jnp.bfloat16))

        b_qkv = jnp.concatenate([(blk["b_Q"] * inv_sqrt_dh).reshape(-1),
                                 blk["b_K"].reshape(-1),
                                 blk["b_V"].reshape(-1)])                 # (96,)
        b_all.append(jnp.stack([pad_lanes(b_qkv, QKV_PAD),
                                pad_lanes(blk["b_O"], QKV_PAD),
                                pad_lanes(blk["b_in"], QKV_PAD),
                                pad_lanes(blk["b_out"], QKV_PAD)], axis=0))  # (4, 128)
        ln_all.append(jnp.stack([blk["ln1_w"], blk["ln1_b"],
                                 blk["ln2_w"], blk["ln2_b"]], axis=0))    # (4, D)

    params["packed"] = {
        "w_qkv": jnp.stack(w_qkv, 0),
        "w_o": jnp.stack(w_o, 0),
        "w_in": jnp.stack(w_in_l, 0),
        "w_out": jnp.stack(w_out_l, 0),
        "b_all": jnp.stack(b_all, 0),
        "ln_all": jnp.stack(ln_all, 0),
        "lnf_wb": jnp.stack([params["lnf_w"], params["lnf_b"]], 0),       # (2, D)
        "W_U_pad": jnp.pad(params["W_U"],
                           ((0, 0), (0, V_PAD - D_VOCAB))).astype(jnp.bfloat16),
        "b_U_pad": jnp.pad(params["b_U"][None, :], ((0, 0), (0, V_PAD - D_VOCAB))),
    }
    return params


# ---------------- pure-JAX f32 reference (mirrors the PyTorch forward) ----------------
def _ln_ref(x, w, b):
    mu = x.mean(-1, keepdims=True)
    xc = x - mu
    var = (xc * xc).mean(-1, keepdims=True)
    return xc / jnp.sqrt(var + EPS) * w + b


def reference_forward(tokens, params):
    B, S = tokens.shape
    resid = params["W_E"][tokens] + params["W_pos"][:S][None]
    mask = jnp.triu(jnp.ones((S, S), bool), k=1)
    for blk in params["blocks"]:
        nx = _ln_ref(resid, blk["ln1_w"], blk["ln1_b"])
        q = jnp.einsum("bpd,hde->bphe", nx, blk["W_Q"]) + blk["b_Q"]
        k = jnp.einsum("bpd,hde->bphe", nx, blk["W_K"]) + blk["b_K"]
        v = jnp.einsum("bpd,hde->bphe", nx, blk["W_V"]) + blk["b_V"]
        s = jnp.einsum("bqhe,bkhe->bhqk", q, k) / math.sqrt(D_HEAD)
        s = jnp.where(mask, IGNORE, s)
        p = jax.nn.softmax(s, axis=-1)
        z = jnp.einsum("bhqk,bkhe->bqhe", p, v)
        attn_out = jnp.einsum("bqhe,hed->bqd", z, blk["W_O"]) + blk["b_O"]
        resid_mid = resid + attn_out
        nm = _ln_ref(resid_mid, blk["ln2_w"], blk["ln2_b"])
        pre = nm @ blk["W_in"] + blk["b_in"]
        post = _gelu_new(pre)
        resid = resid_mid + post @ blk["W_out"] + blk["b_out"]
    nf = _ln_ref(resid, params["lnf_w"], params["lnf_b"])
    return nf @ params["W_U"] + params["b_U"]


if __name__ == "__main__":
    key = jax.random.PRNGKey(0)
    pkey, tkey = jax.random.split(key)
    params = make_params(pkey)

    B, S = 2, 8
    tokens = jax.random.randint(tkey, (B, S), 0, D_VOCAB, dtype=jnp.int32)

    logits = demo_transformer_forward(tokens, params)
    logits = jax.block_until_ready(logits)

    ref = reference_forward(tokens, params)
    assert logits.shape == (B, S, D_VOCAB)
    assert bool(jnp.all(jnp.isfinite(logits)))
    max_err = float(jnp.max(jnp.abs(logits - ref)))
    # bf16 MXU operands (f32 accumulation) vs. all-f32 reference -> slightly looser atol.
    assert bool(jnp.allclose(logits, ref, atol=5e-3, rtol=2e-2)), \
        f"max abs err {max_err}"
    print("KERNEL_OK")
</pallas_src>

<mosaic_0001>
module attributes {stable_mosaic.version = 11 : i64} {
  func.func @fused_forward_kernel(%arg0: i32, %arg1: memref<1x8x32xf32, #tpu.memory_space<vmem>>, %arg2: memref<2x32x128xbf16, #tpu.memory_space<vmem>>, %arg3: memref<2x4x8x32xbf16, #tpu.memory_space<vmem>>, %arg4: memref<2x32x64xbf16, #tpu.memory_space<vmem>>, %arg5: memref<2x64x32xbf16, #tpu.memory_space<vmem>>, %arg6: memref<2x4x128xf32, #tpu.memory_space<vmem>>, %arg7: memref<2x4x32xf32, #tpu.memory_space<vmem>>, %arg8: memref<2x32xf32, #tpu.memory_space<vmem>>, %arg9: memref<32x128xbf16, #tpu.memory_space<vmem>>, %arg10: memref<1x128xf32, #tpu.memory_space<vmem>>, %arg11: memref<1x8x128xf32, #tpu.memory_space<vmem>>) attributes {dimension_semantics = [#tpu.dimension_semantics<parallel>], iteration_bounds = array<i64: 2>, scalar_prefetch = 0 : i64, scratch_operands = 0 : i64, tpu.core_type = #tpu.core_type<tc>, window_params = [{transform_indices = @transform_0, window_bounds = array<i64: 1, 8, 32>}, {pipeline_mode = #tpu.pipeline_mode<synchronous>, transform_indices = @transform_1, window_bounds = array<i64: 2, 32, 128>}, {pipeline_mode = #tpu.pipeline_mode<synchronous>, transform_indices = @transform_2, window_bounds = array<i64: 2, 4, 8, 32>}, {pipeline_mode = #tpu.pipeline_mode<synchronous>, transform_indices = @transform_3, window_bounds = array<i64: 2, 32, 64>}, {pipeline_mode = #tpu.pipeline_mode<synchronous>, transform_indices = @transform_4, window_bounds = array<i64: 2, 64, 32>}, {pipeline_mode = #tpu.pipeline_mode<synchronous>, transform_indices = @transform_5, window_bounds = array<i64: 2, 4, 128>}, {pipeline_mode = #tpu.pipeline_mode<synchronous>, transform_indices = @transform_6, window_bounds = array<i64: 2, 4, 32>}, {pipeline_mode = #tpu.pipeline_mode<synchronous>, transform_indices = @transform_7, window_bounds = array<i64: 2, 32>}, {pipeline_mode = #tpu.pipeline_mode<synchronous>, transform_indices = @transform_8, window_bounds = array<i64: 32, 128>}, {pipeline_mode = #tpu.pipeline_mode<synchronous>, transform_indices = @transform_9, window_bounds = array<i64: 1, 128>}, {transform_indices = @transform_10, window_bounds = array<i64: 1, 8, 128>}]} {
    %c0 = arith.constant 0 : index
    %c0_0 = arith.constant 0 : index
    %c0_1 = arith.constant 0 : index
    %0 = vector.load %arg1[%c0, %c0_0, %c0_1] : memref<1x8x32xf32, #tpu.memory_space<vmem>>, vector<1x8x32xf32>
    %1 = vector.shape_cast %0 : vector<1x8x32xf32> to vector<8x32xf32>
    %2 = tpu.iota {dimensions = array<i32: 0>} : vector<8x8xi32>
    %3 = tpu.iota {dimensions = array<i32: 1>} : vector<8x8xi32>
    %4 = arith.cmpi sle, %3, %2 : vector<8x8xi32>
    %5 = arith.extui %4 : vector<8x8xi1> to vector<8x8xi32>
    %6 = arith.sitofp %5 : vector<8x8xi32> to vector<8x8xf32>
    %7 = vector.shape_cast %6 : vector<8x8xf32> to vector<1x8x8xf32>
    %c0_2 = arith.constant 0 : index
    %c0_3 = arith.constant 0 : index
    %c0_4 = arith.constant 0 : index
    %8 = vector.load %arg7[%c0_2, %c0_3, %c0_4] : memref<2x4x32xf32, #tpu.memory_space<vmem>>, vector<1x4x32xf32>
    %9 = vector.shape_cast %8 : vector<1x4x32xf32> to vector<4x32xf32>
    %c0_5 = arith.constant 0 : index
    %c0_6 = arith.constant 0 : index
    %c0_7 = arith.constant 0 : index
    %10 = vector.load %arg6[%c0_5, %c0_6, %c0_7] : memref<2x4x128xf32, #tpu.memory_space<vmem>>, vector<1x4x128xf32>
    %11 = vector.shape_cast %10 : vector<1x4x128xf32> to vector<4x128xf32>
    %12 = vector.extract_strided_slice %9 {offsets = [0, 0], sizes = [1, 32], strides = [1, 1]} : vector<4x32xf32> to vector<1x32xf32>
    %13 = vector.extract_strided_slice %9 {offsets = [1, 0], sizes = [1, 32], strides = [1, 1]} : vector<4x32xf32> to vector<1x32xf32>
    %cst = arith.constant dense<0.000000e+00> : vector<8xf32>
    %14 = vector.multi_reduction <add>, %1, %cst [1] : vector<8x32xf32> to vector<8xf32>
    %15 = vector.shape_cast %14 : vector<8xf32> to vector<8x1xf32>
    %cst_8 = arith.constant 3.200000e+01 : f32
    %16 = vector.broadcast %cst_8 : f32 to vector<8x1xf32>
    %17 = arith.divf %15, %16 : vector<8x1xf32>
    %18 = vector.broadcast %17 : vector<8x1xf32> to vector<8x32xf32>
    %19 = arith.subf %1, %18 : vector<8x32xf32>
    %20 = arith.mulf %19, %19 : vector<8x32xf32>
    %cst_9 = arith.constant dense<0.000000e+00> : vector<8xf32>
    %21 = vector.multi_reduction <add>, %20, %cst_9 [1] : vector<8x32xf32> to vector<8xf32>
    %22 = vector.shape_cast %21 : vector<8xf32> to vector<8x1xf32>
    %cst_10 = arith.constant 3.200000e+01 : f32
    %23 = vector.broadcast %cst_10 : f32 to vector<8x1xf32>
    %24 = arith.divf %22, %23 : vector<8x1xf32>
    %cst_11 = arith.constant 9.99999974E-6 : f32
    %25 = vector.broadcast %cst_11 : f32 to vector<8x1xf32>
    %26 = arith.addf %24, %25 : vector<8x1xf32>
    %27 = math.rsqrt %26 : vector<8x1xf32>
    %28 = vector.broadcast %27 : vector<8x1xf32> to vector<8x32xf32>
    %29 = arith.mulf %19, %28 : vector<8x32xf32>
    %30 = vector.broadcast %12 : vector<1x32xf32> to vector<8x32xf32>
    %31 = arith.mulf %29, %30 : vector<8x32xf32>
    %32 = vector.broadcast %13 : vector<1x32xf32> to vector<8x32xf32>
    %33 = arith.addf %31, %32 : vector<8x32xf32>
    %34 = arith.truncf %33 : vector<8x32xf32> to vector<8x32xbf16>
    %c0_12 = arith.constant 0 : index
    %c0_13 = arith.constant 0 : index
    %c0_14 = arith.constant 0 : index
    %35 = vector.load %arg2[%c0_12, %c0_13, %c0_14] : memref<2x32x128xbf16, #tpu.memory_space<vmem>>, vector<1x32x128xbf16>
    %36 = vector.shape_cast %35 : vector<1x32x128xbf16> to vector<32x128xbf16>
    %cst_15 = arith.constant dense<0.000000e+00> : vector<8x128xf32>
    %37 = tpu.matmul %34, %36, %cst_15 {dimension_numbers = #tpu.dot_dimension_numbers<[1], [0], [0], [1], [0, 0, 1, 1], [], []>} : vector<8x32xbf16>, vector<32x128xbf16>, vector<8x128xf32> -> vector<8x128xf32>
    %38 = vector.extract_strided_slice %11 {offsets = [0, 0], sizes = [1, 128], strides = [1, 1]} : vector<4x128xf32> to vector<1x128xf32>
    %39 = vector.broadcast %38 : vector<1x128xf32> to vector<8x128xf32>
    %40 = arith.addf %37, %39 : vector<8x128xf32>
    %41 = vector.extract_strided_slice %40 {offsets = [0, 0], sizes = [8, 96], strides = [1, 1]} : vector<8x128xf32> to vector<8x96xf32>
    %42 = vector.shape_cast %41 : vector<8x96xf32> to vector<8x12x8xf32>
    %43 = tpu.transpose %42, [1, 0, 2] : vector<8x12x8xf32> -> vector<12x8x8xf32>
    %44 = vector.extract_strided_slice %43 {offsets = [0, 0, 0], sizes = [4, 8, 8], strides = [1, 1, 1]} : vector<12x8x8xf32> to vector<4x8x8xf32>
    %45 = vector.extract_strided_slice %43 {offsets = [4, 0, 0], sizes = [4, 8, 8], strides = [1, 1, 1]} : vector<12x8x8xf32> to vector<4x8x8xf32>
    %46 = vector.extract_strided_slice %43 {offsets = [8, 0, 0], sizes = [4, 8, 8], strides = [1, 1, 1]} : vector<12x8x8xf32> to vector<4x8x8xf32>
    "tpu.trace_start"() <{level = 10 : i32, message = "hqd,hkd->hqk"}> : () -> ()
    %cst_16 = arith.constant dense<0.000000e+00> : vector<4x8x8xf32>
    %47 = tpu.matmul %44, %45, %cst_16 {dimension_numbers = #tpu.dot_dimension_numbers<[2], [2], [1], [1], [0, 0, 0, 1, 1, 1], [0], [0]>} : vector<4x8x8xf32>, vector<4x8x8xf32>, vector<4x8x8xf32> -> vector<4x8x8xf32>
    "tpu.trace_stop"() : () -> ()
    %48 = math.exp %47 : vector<4x8x8xf32>
    %49 = vector.broadcast %7 : vector<1x8x8xf32> to vector<4x8x8xf32>
    %50 = arith.mulf %48, %49 : vector<4x8x8xf32>
    %cst_17 = arith.constant dense<0.000000e+00> : vector<4x8xf32>
    %51 = vector.multi_reduction <add>, %50, %cst_17 [2] : vector<4x8x8xf32> to vector<4x8xf32>
    %52 = vector.shape_cast %51 : vector<4x8xf32> to vector<4x8x1xf32>
    %53 = tpu.reciprocal %52 {approx = true} : vector<4x8x1xf32> -> vector<4x8x1xf32>
    %54 = vector.broadcast %53 : vector<4x8x1xf32> to vector<4x8x8xf32>
    %55 = arith.mulf %50, %54 : vector<4x8x8xf32>
    "tpu.trace_start"() <{level = 10 : i32, message = "hqk,hkd->hqd"}> : () -> ()
    %cst_18 = arith.constant dense<0.000000e+00> : vector<4x8x8xf32>
    %56 = tpu.matmul %55, %46, %cst_18 {dimension_numbers = #tpu.dot_dimension_numbers<[2], [1], [1], [2], [0, 0, 0, 1, 1, 2], [0], [0]>} : vector<4x8x8xf32>, vector<4x8x8xf32>, vector<4x8x8xf32> -> vector<4x8x8xf32>
    "tpu.trace_stop"() : () -> ()
    %57 = arith.truncf %56 : vector<4x8x8xf32> to vector<4x8x8xbf16>
    %c0_19 = arith.constant 0 : index
    %c0_20 = arith.constant 0 : index
    %c0_21 = arith.constant 0 : index
    %c0_22 = arith.constant 0 : index
    %58 = vector.load %arg3[%c0_19, %c0_20, %c0_21, %c0_22] : memref<2x4x8x32xbf16, #tpu.memory_space<vmem>>, vector<1x4x8x32xbf16>
    %59 = vector.shape_cast %58 : vector<1x4x8x32xbf16> to vector<4x8x32xbf16>
    "tpu.trace_start"() <{level = 10 : i32, message = "hqd,hdm->hqm"}> : () -> ()
    %cst_23 = arith.constant dense<0.000000e+00> : vector<4x8x32xf32>
    %60 = tpu.matmul %57, %59, %cst_23 {dimension_numbers = #tpu.dot_dimension_numbers<[2], [1], [1], [2], [0, 0, 0, 1, 1, 2], [0], [0]>} : vector<4x8x8xbf16>, vector<4x8x32xbf16>, vector<4x8x32xf32> -> vector<4x8x32xf32>
    "tpu.trace_stop"() : () -> ()
    %cst_24 = arith.constant dense<0.000000e+00> : vector<8x32xf32>
    %61 = vector.multi_reduction <add>, %60, %cst_24 [0] : vector<4x8x32xf32> to vector<8x32xf32>
    %62 = arith.addf %1, %61 : vector<8x32xf32>
    %63 = vector.extract_strided_slice %11 {offsets = [1, 0], sizes = [1, 32], strides = [1, 1]} : vector<4x128xf32> to vector<1x32xf32>
    %64 = vector.broadcast %63 : vector<1x32xf32> to vector<8x32xf32>
    %65 = arith.addf %62, %64 : vector<8x32xf32>
    %66 = vector.extract_strided_slice %9 {offsets = [2, 0], sizes = [1, 32], strides = [1, 1]} : vector<4x32xf32> to vector<1x32xf32>
    %67 = vector.extract_strided_slice %9 {offsets = [3, 0], sizes = [1, 32], strides = [1, 1]} : vector<4x32xf32> to vector<1x32xf32>
    %cst_25 = arith.constant dense<0.000000e+00> : vector<8xf32>
    %68 = vector.multi_reduction <add>, %65, %cst_25 [1] : vector<8x32xf32> to vector<8xf32>
    %69 = vector.shape_cast %68 : vector<8xf32> to vector<8x1xf32>
    %cst_26 = arith.constant 3.200000e+01 : f32
    %70 = vector.broadcast %cst_26 : f32 to vector<8x1xf32>
    %71 = arith.divf %69, %70 : vector<8x1xf32>
    %72 = vector.broadcast %71 : vector<8x1xf32> to vector<8x32xf32>
    %73 = arith.subf %65, %72 : vector<8x32xf32>
    %74 = arith.mulf %73, %73 : vector<8x32xf32>
    %cst_27 = arith.constant dense<0.000000e+00> : vector<8xf32>
    %75 = vector.multi_reduction <add>, %74, %cst_27 [1] : vector<8x32xf32> to vector<8xf32>
    %76 = vector.shape_cast %75 : vector<8xf32> to vector<8x1xf32>
    %cst_28 = arith.constant 3.200000e+01 : f32
    %77 = vector.broadcast %cst_28 : f32 to vector<8x1xf32>
    %78 = arith.divf %76, %77 : vector<8x1xf32>
    %cst_29 = arith.constant 9.99999974E-6 : f32
    %79 = vector.broadcast %cst_29 : f32 to vector<8x1xf32>
    %80 = arith.addf %78, %79 : vector<8x1xf32>
    %81 = math.rsqrt %80 : vector<8x1xf32>
    %82 = vector.broadcast %81 : vector<8x1xf32> to vector<8x32xf32>
    %83 = arith.mulf %73, %82 : vector<8x32xf32>
    %84 = vector.broadcast %66 : vector<1x32xf32> to vector<8x32xf32>
    %85 = arith.mulf %83, %84 : vector<8x32xf32>
    %86 = vector.broadcast %67 : vector<1x32xf32> to vector<8x32xf32>
    %87 = arith.addf %85, %86 : vector<8x32xf32>
    %88 = arith.truncf %87 : vector<8x32xf32> to vector<8x32xbf16>
    %c0_30 = arith.constant 0 : index
    %c0_31 = arith.constant 0 : index
    %c0_32 = arith.constant 0 : index
    %89 = vector.load %arg4[%c0_30, %c0_31, %c0_32] : memref<2x32x64xbf16, #tpu.memory_space<vmem>>, vector<1x32x64xbf16>
    %90 = vector.shape_cast %89 : vector<1x32x64xbf16> to vector<32x64xbf16>
    %cst_33 = arith.constant dense<0.000000e+00> : vector<8x64xf32>
    %91 = tpu.matmul %88, %90, %cst_33 {dimension_numbers = #tpu.dot_dimension_numbers<[1], [0], [0], [1], [0, 0, 1, 1], [], []>} : vector<8x32xbf16>, vector<32x64xbf16>, vector<8x64xf32> -> vector<8x64xf32>
    %92 = vector.extract_strided_slice %11 {offsets = [2, 0], sizes = [1, 64], strides = [1, 1]} : vector<4x128xf32> to vector<1x64xf32>
    %93 = vector.broadcast %92 : vector<1x64xf32> to vector<8x64xf32>
    %94 = arith.addf %91, %93 : vector<8x64xf32>
    %cst_34 = arith.constant 5.000000e-01 : f32
    %95 = vector.broadcast %cst_34 : f32 to vector<8x64xf32>
    %96 = arith.mulf %95, %94 : vector<8x64xf32>
    %cst_35 = arith.constant 0.636619746 : f32
    %97 = math.sqrt %cst_35 : f32
    %cst_36 = arith.constant 4.471500e-02 : f32
    %98 = vector.broadcast %cst_36 : f32 to vector<8x64xf32>
    %99 = arith.mulf %98, %94 : vector<8x64xf32>
    %100 = arith.mulf %99, %94 : vector<8x64xf32>
    %101 = arith.mulf %100, %94 : vector<8x64xf32>
    %102 = arith.addf %94, %101 : vector<8x64xf32>
    %103 = vector.broadcast %97 : f32 to vector<8x64xf32>
    %104 = arith.mulf %103, %102 : vector<8x64xf32>
    %105 = math.tanh %104 : vector<8x64xf32>
    %cst_37 = arith.constant 1.000000e+00 : f32
    %106 = vector.broadcast %cst_37 : f32 to vector<8x64xf32>
    %107 = arith.addf %106, %105 : vector<8x64xf32>
    %108 = arith.mulf %96, %107 : vector<8x64xf32>
    %109 = arith.truncf %108 : vector<8x64xf32> to vector<8x64xbf16>
    %c0_38 = arith.constant 0 : index
    %c0_39 = arith.constant 0 : index
    %c0_40 = arith.constant 0 : index
    %110 = vector.load %arg5[%c0_38, %c0_39, %c0_40] : memref<2x64x32xbf16, #tpu.memory_space<vmem>>, vector<1x64x32xbf16>
    %111 = vector.shape_cast %110 : vector<1x64x32xbf16> to vector<64x32xbf16>
    %cst_41 = arith.constant dense<0.000000e+00> : vector<8x32xf32>
    %112 = tpu.matmul %109, %111, %cst_41 {dimension_numbers = #tpu.dot_dimension_numbers<[1], [0], [0], [1], [0, 0, 1, 1], [], []>} : vector<8x64xbf16>, vector<64x32xbf16>, vector<8x32xf32> -> vector<8x32xf32>
    %113 = vector.extract_strided_slice %11 {offsets = [3, 0], sizes = [1, 32], strides = [1, 1]} : vector<4x128xf32> to vector<1x32xf32>
    %114 = vector.broadcast %113 : vector<1x32xf32> to vector<8x32xf32>
    %115 = arith.addf %112, %114 : vector<8x32xf32>
    %116 = arith.addf %65, %115 : vector<8x32xf32>
    %c1 = arith.constant 1 : index
    %c0_42 = arith.constant 0 : index
    %c0_43 = arith.constant 0 : index
    %117 = vector.load %arg7[%c1, %c0_42, %c0_43] : memref<2x4x32xf32, #tpu.memory_space<vmem>>, vector<1x4x32xf32>
    %118 = vector.shape_cast %117 : vector<1x4x32xf32> to vector<4x32xf32>
    %c1_44 = arith.constant 1 : index
    %c0_45 = arith.constant 0 : index
    %c0_46 = arith.constant 0 : index
    %119 = vector.load %arg6[%c1_44, %c0_45, %c0_46] : memref<2x4x128xf32, #tpu.memory_space<vmem>>, vector<1x4x128xf32>
    %120 = vector.shape_cast %119 : vector<1x4x128xf32> to vector<4x128xf32>
    %121 = vector.extract_strided_slice %118 {offsets = [0, 0], sizes = [1, 32], strides = [1, 1]} : vector<4x32xf32> to vector<1x32xf32>
    %122 = vector.extract_strided_slice %118 {offsets = [1, 0], sizes = [1, 32], strides = [1, 1]} : vector<4x32xf32> to vector<1x32xf32>
    %cst_47 = arith.constant dense<0.000000e+00> : vector<8xf32>
    %123 = vector.multi_reduction <add>, %116, %cst_47 [1] : vector<8x32xf32> to vector<8xf32>
    %124 = vector.shape_cast %123 : vector<8xf32> to vector<8x1xf32>
    %cst_48 = arith.constant 3.200000e+01 : f32
    %125 = vector.broadcast %cst_48 : f32 to vector<8x1xf32>
    %126 = arith.divf %124, %125 : vector<8x1xf32>
    %127 = vector.broadcast %126 : vector<8x1xf32> to vector<8x32xf32>
    %128 = arith.subf %116, %127 : vector<8x32xf32>
    %129 = arith.mulf %128, %128 : vector<8x32xf32>
    %cst_49 = arith.constant dense<0.000000e+00> : vector<8xf32>
    %130 = vector.multi_reduction <add>, %129, %cst_49 [1] : vector<8x32xf32> to vector<8xf32>
    %131 = vector.shape_cast %130 : vector<8xf32> to vector<8x1xf32>
    %cst_50 = arith.constant 3.200000e+01 : f32
    %132 = vector.broadcast %cst_50 : f32 to vector<8x1xf32>
    %133 = arith.divf %131, %132 : vector<8x1xf32>
    %cst_51 = arith.constant 9.99999974E-6 : f32
    %134 = vector.broadcast %cst_51 : f32 to vector<8x1xf32>
    %135 = arith.addf %133, %134 : vector<8x1xf32>
    %136 = math.rsqrt %135 : vector<8x1xf32>
    %137 = vector.broadcast %136 : vector<8x1xf32> to vector<8x32xf32>
    %138 = arith.mulf %128, %137 : vector<8x32xf32>
    %139 = vector.broadcast %121 : vector<1x32xf32> to vector<8x32xf32>
    %140 = arith.mulf %138, %139 : vector<8x32xf32>
    %141 = vector.broadcast %122 : vector<1x32xf32> to vector<8x32xf32>
    %142 = arith.addf %140, %141 : vector<8x32xf32>
    %143 = arith.truncf %142 : vector<8x32xf32> to vector<8x32xbf16>
    %c1_52 = arith.constant 1 : index
    %c0_53 = arith.constant 0 : index
    %c0_54 = arith.constant 0 : index
    %144 = vector.load %arg2[%c1_52, %c0_53, %c0_54] : memref<2x32x128xbf16, #tpu.memory_space<vmem>>, vector<1x32x128xbf16>
    %145 = vector.shape_cast %144 : vector<1x32x128xbf16> to vector<32x128xbf16>
    %cst_55 = arith.constant dense<0.000000e+00> : vector<8x128xf32>
    %146 = tpu.matmul %143, %145, %cst_55 {dimension_numbers = #tpu.dot_dimension_numbers<[1], [0], [0], [1], [0, 0, 1, 1], [], []>} : vector<8x32xbf16>, vector<32x128xbf16>, vector<8x128xf32> -> vector<8x128xf32>
    %147 = vector.extract_strided_slice %120 {offsets = [0, 0], sizes = [1, 128], strides = [1, 1]} : vector<4x128xf32> to vector<1x128xf32>
    %148 = vector.broadcast %147 : vector<1x128xf32> to vector<8x128xf32>
    %149 = arith.addf %146, %148 : vector<8x128xf32>
    %150 = vector.extract_strided_slice %149 {offsets = [0, 0], sizes = [8, 96], strides = [1, 1]} : vector<8x128xf32> to vector<8x96xf32>
    %151 = vector.shape_cast %150 : vector<8x96xf32> to vector<8x12x8xf32>
    %152 = tpu.transpose %151, [1, 0, 2] : vector<8x12x8xf32> -> vector<12x8x8xf32>
    %153 = vector.extract_strided_slice %152 {offsets = [0, 0, 0], sizes = [4, 8, 8], strides = [1, 1, 1]} : vector<12x8x8xf32> to vector<4x8x8xf32>
    %154 = vector.extract_strided_slice %152 {offsets = [4, 0, 0], sizes = [4, 8, 8], strides = [1, 1, 1]} : vector<12x8x8xf32> to vector<4x8x8xf32>
    %155 = vector.extract_strided_slice %152 {offsets = [8, 0, 0], sizes = [4, 8, 8], strides = [1, 1, 1]} : vector<12x8x8xf32> to vector<4x8x8xf32>
    "tpu.trace_start"() <{level = 10 : i32, message = "hqd,hkd->hqk"}> : () -> ()
    %cst_56 = arith.constant dense<0.000000e+00> : vector<4x8x8xf32>
    %156 = tpu.matmul %153, %154, %cst_56 {dimension_numbers = #tpu.dot_dimension_numbers<[2], [2], [1], [1], [0, 0, 0, 1, 1, 1], [0], [0]>} : vector<4x8x8xf32>, vector<4x8x8xf32>, vector<4x8x8xf32> -> vector<4x8x8xf32>
    "tpu.trace_stop"() : () -> ()
    %157 = math.exp %156 : vector<4x8x8xf32>
    %158 = vector.broadcast %7 : vector<1x8x8xf32> to vector<4x8x8xf32>
    %159 = arith.mulf %157, %158 : vector<4x8x8xf32>
    %cst_57 = arith.constant dense<0.000000e+00> : vector<4x8xf32>
    %160 = vector.multi_reduction <add>, %159, %cst_57 [2] : vector<4x8x8xf32> to vector<4x8xf32>
    %161 = vector.shape_cast %160 : vector<4x8xf32> to vector<4x8x1xf32>
    %162 = tpu.reciprocal %161 {approx = true} : vector<4x8x1xf32> -> vector<4x8x1xf32>
    %163 = vector.broadcast %162 : vector<4x8x1xf32> to vector<4x8x8xf32>
    %164 = arith.mulf %159, %163 : vector<4x8x8xf32>
    "tpu.trace_start"() <{level = 10 : i32, message = "hqk,hkd->hqd"}> : () -> ()
    %cst_58 = arith.constant dense<0.000000e+00> : vector<4x8x8xf32>
    %165 = tpu.matmul %164, %155, %cst_58 {dimension_numbers = #tpu.dot_dimension_numbers<[2], [1], [1], [2], [0, 0, 0, 1, 1, 2], [0], [0]>} : vector<4x8x8xf32>, vector<4x8x8xf32>, vector<4x8x8xf32> -> vector<4x8x8xf32>
    "tpu.trace_stop"() : () -> ()
    %166 = arith.truncf %165 : vector<4x8x8xf32> to vector<4x8x8xbf16>
    %c1_59 = arith.constant 1 : index
    %c0_60 = arith.constant 0 : index
    %c0_61 = arith.constant 0 : index
    %c0_62 = arith.constant 0 : index
    %167 = vector.load %arg3[%c1_59, %c0_60, %c0_61, %c0_62] : memref<2x4x8x32xbf16, #tpu.memory_space<vmem>>, vector<1x4x8x32xbf16>
    %168 = vector.shape_cast %167 : vector<1x4x8x32xbf16> to vector<4x8x32xbf16>
    "tpu.trace_start"() <{level = 10 : i32, message = "hqd,hdm->hqm"}> : () -> ()
    %cst_63 = arith.constant dense<0.000000e+00> : vector<4x8x32xf32>
    %169 = tpu.matmul %166, %168, %cst_63 {dimension_numbers = #tpu.dot_dimension_numbers<[2], [1], [1], [2], [0, 0, 0, 1, 1, 2], [0], [0]>} : vector<4x8x8xbf16>, vector<4x8x32xbf16>, vector<4x8x32xf32> -> vector<4x8x32xf32>
    "tpu.trace_stop"() : () -> ()
    %cst_64 = arith.constant dense<0.000000e+00> : vector<8x32xf32>
    %170 = vector.multi_reduction <add>, %169, %cst_64 [0] : vector<4x8x32xf32> to vector<8x32xf32>
    %171 = arith.addf %116, %170 : vector<8x32xf32>
    %172 = vector.extract_strided_slice %120 {offsets = [1, 0], sizes = [1, 32], strides = [1, 1]} : vector<4x128xf32> to vector<1x32xf32>
    %173 = vector.broadcast %172 : vector<1x32xf32> to vector<8x32xf32>
    %174 = arith.addf %171, %173 : vector<8x32xf32>
    %175 = vector.extract_strided_slice %118 {offsets = [2, 0], sizes = [1, 32], strides = [1, 1]} : vector<4x32xf32> to vector<1x32xf32>
    %176 = vector.extract_strided_slice %118 {offsets = [3, 0], sizes = [1, 32], strides = [1, 1]} : vector<4x32xf32> to vector<1x32xf32>
    %cst_65 = arith.constant dense<0.000000e+00> : vector<8xf32>
    %177 = vector.multi_reduction <add>, %174, %cst_65 [1] : vector<8x32xf32> to vector<8xf32>
    %178 = vector.shape_cast %177 : vector<8xf32> to vector<8x1xf32>
    %cst_66 = arith.constant 3.200000e+01 : f32
    %179 = vector.broadcast %cst_66 : f32 to vector<8x1xf32>
    %180 = arith.divf %178, %179 : vector<8x1xf32>
    %181 = vector.broadcast %180 : vector<8x1xf32> to vector<8x32xf32>
    %182 = arith.subf %174, %181 : vector<8x32xf32>
    %183 = arith.mulf %182, %182 : vector<8x32xf32>
    %cst_67 = arith.constant dense<0.000000e+00> : vector<8xf32>
    %184 = vector.multi_reduction <add>, %183, %cst_67 [1] : vector<8x32xf32> to vector<8xf32>
    %185 = vector.shape_cast %184 : vector<8xf32> to vector<8x1xf32>
    %cst_68 = arith.constant 3.200000e+01 : f32
    %186 = vector.broadcast %cst_68 : f32 to vector<8x1xf32>
    %187 = arith.divf %185, %186 : vector<8x1xf32>
    %cst_69 = arith.constant 9.99999974E-6 : f32
    %188 = vector.broadcast %cst_69 : f32 to vector<8x1xf32>
    %189 = arith.addf %187, %188 : vector<8x1xf32>
    %190 = math.rsqrt %189 : vector<8x1xf32>
    %191 = vector.broadcast %190 : vector<8x1xf32> to vector<8x32xf32>
    %192 = arith.mulf %182, %191 : vector<8x32xf32>
    %193 = vector.broadcast %175 : vector<1x32xf32> to vector<8x32xf32>
    %194 = arith.mulf %192, %193 : vector<8x32xf32>
    %195 = vector.broadcast %176 : vector<1x32xf32> to vector<8x32xf32>
    %196 = arith.addf %194, %195 : vector<8x32xf32>
    %197 = arith.truncf %196 : vector<8x32xf32> to vector<8x32xbf16>
    %c1_70 = arith.constant 1 : index
    %c0_71 = arith.constant 0 : index
    %c0_72 = arith.constant 0 : index
    %198 = vector.load %arg4[%c1_70, %c0_71, %c0_72] : memref<2x32x64xbf16, #tpu.memory_space<vmem>>, vector<1x32x64xbf16>
    %199 = vector.shape_cast %198 : vector<1x32x64xbf16> to vector<32x64xbf16>
    %cst_73 = arith.constant dense<0.000000e+00> : vector<8x64xf32>
    %200 = tpu.matmul %197, %199, %cst_73 {dimension_numbers = #tpu.dot_dimension_numbers<[1], [0], [0], [1], [0, 0, 1, 1], [], []>} : vector<8x32xbf16>, vector<32x64xbf16>, vector<8x64xf32> -> vector<8x64xf32>
    %201 = vector.extract_strided_slice %120 {offsets = [2, 0], sizes = [1, 64], strides = [1, 1]} : vector<4x128xf32> to vector<1x64xf32>
    %202 = vector.broadcast %201 : vector<1x64xf32> to vector<8x64xf32>
    %203 = arith.addf %200, %202 : vector<8x64xf32>
    %cst_74 = arith.constant 5.000000e-01 : f32
    %204 = vector.broadcast %cst_74 : f32 to vector<8x64xf32>
    %205 = arith.mulf %204, %203 : vector<8x64xf32>
    %cst_75 = arith.constant 0.636619746 : f32
    %206 = math.sqrt %cst_75 : f32
    %cst_76 = arith.constant 4.471500e-02 : f32
    %207 = vector.broadcast %cst_76 : f32 to vector<8x64xf32>
    %208 = arith.mulf %207, %203 : vector<8x64xf32>
    %209 = arith.mulf %208, %203 : vector<8x64xf32>
    %210 = arith.mulf %209, %203 : vector<8x64xf32>
    %211 = arith.addf %203, %210 : vector<8x64xf32>
    %212 = vector.broadcast %206 : f32 to vector<8x64xf32>
    %213 = arith.mulf %212, %211 : vector<8x64xf32>
    %214 = math.tanh %213 : vector<8x64xf32>
    %cst_77 = arith.constant 1.000000e+00 : f32
    %215 = vector.broadcast %cst_77 : f32 to vector<8x64xf32>
    %216 = arith.addf %215, %214 : vector<8x64xf32>
    %217 = arith.mulf %205, %216 : vector<8x64xf32>
    %218 = arith.truncf %217 : vector<8x64xf32> to vector<8x64xbf16>
    %c1_78 = arith.constant 1 : index
    %c0_79 = arith.constant 0 : index
    %c0_80 = arith.constant 0 : index
    %219 = vector.load %arg5[%c1_78, %c0_79, %c0_80] : memref<2x64x32xbf16, #tpu.memory_space<vmem>>, vector<1x64x32xbf16>
    %220 = vector.shape_cast %219 : vector<1x64x32xbf16> to vector<64x32xbf16>
    %cst_81 = arith.constant dense<0.000000e+00> : vector<8x32xf32>
    %221 = tpu.matmul %218, %220, %cst_81 {dimension_numbers = #tpu.dot_dimension_numbers<[1], [0], [0], [1], [0, 0, 1, 1], [], []>} : vector<8x64xbf16>, vector<64x32xbf16>, vector<8x32xf32> -> vector<8x32xf32>
    %222 = vector.extract_strided_slice %120 {offsets = [3, 0], sizes = [1, 32], strides = [1, 1]} : vector<4x128xf32> to vector<1x32xf32>
    %223 = vector.broadcast %222 : vector<1x32xf32> to vector<8x32xf32>
    %224 = arith.addf %221, %223 : vector<8x32xf32>
    %225 = arith.addf %174, %224 : vector<8x32xf32>
    %c0_82 = arith.constant 0 : index
    %c0_83 = arith.constant 0 : index
    %226 = vector.load %arg8[%c0_82, %c0_83] : memref<2x32xf32, #tpu.memory_space<vmem>>, vector<1x32xf32>
    %c1_84 = arith.constant 1 : index
    %c0_85 = arith.constant 0 : index
    %227 = vector.load %arg8[%c1_84, %c0_85] : memref<2x32xf32, #tpu.memory_space<vmem>>, vector<1x32xf32>
    %cst_86 = arith.constant dense<0.000000e+00> : vector<8xf32>
    %228 = vector.multi_reduction <add>, %225, %cst_86 [1] : vector<8x32xf32> to vector<8xf32>
    %229 = vector.shape_cast %228 : vector<8xf32> to vector<8x1xf32>
    %cst_87 = arith.constant 3.200000e+01 : f32
    %230 = vector.broadcast %cst_87 : f32 to vector<8x1xf32>
    %231 = arith.divf %229, %230 : vector<8x1xf32>
    %232 = vector.broadcast %231 : vector<8x1xf32> to vector<8x32xf32>
    %233 = arith.subf %225, %232 : vector<8x32xf32>
    %234 = arith.mulf %233, %233 : vector<8x32xf32>
    %cst_88 = arith.constant dense<0.000000e+00> : vector<8xf32>
    %235 = vector.multi_reduction <add>, %234, %cst_88 [1] : vector<8x32xf32> to vector<8xf32>
    %236 = vector.shape_cast %235 : vector<8xf32> to vector<8x1xf32>
    %cst_89 = arith.constant 3.200000e+01 : f32
    %237 = vector.broadcast %cst_89 : f32 to vector<8x1xf32>
    %238 = arith.divf %236, %237 : vector<8x1xf32>
    %cst_90 = arith.constant 9.99999974E-6 : f32
    %239 = vector.broadcast %cst_90 : f32 to vector<8x1xf32>
    %240 = arith.addf %238, %239 : vector<8x1xf32>
    %241 = math.rsqrt %240 : vector<8x1xf32>
    %242 = vector.broadcast %241 : vector<8x1xf32> to vector<8x32xf32>
    %243 = arith.mulf %233, %242 : vector<8x32xf32>
    %244 = vector.broadcast %226 : vector<1x32xf32> to vector<8x32xf32>
    %245 = arith.mulf %243, %244 : vector<8x32xf32>
    %246 = vector.broadcast %227 : vector<1x32xf32> to vector<8x32xf32>
    %247 = arith.addf %245, %246 : vector<8x32xf32>
    %248 = arith.truncf %247 : vector<8x32xf32> to vector<8x32xbf16>
    %c0_91 = arith.constant 0 : index
    %c0_92 = arith.constant 0 : index
    %249 = vector.load %arg9[%c0_91, %c0_92] : memref<32x128xbf16, #tpu.memory_space<vmem>>, vector<32x128xbf16>
    %cst_93 = arith.constant dense<0.000000e+00> : vector<8x128xf32>
    %250 = tpu.matmul %248, %249, %cst_93 {dimension_numbers = #tpu.dot_dimension_numbers<[1], [0], [0], [1], [0, 0, 1, 1], [], []>} : vector<8x32xbf16>, vector<32x128xbf16>, vector<8x128xf32> -> vector<8x128xf32>
    %c0_94 = arith.constant 0 : index
    %c0_95 = arith.constant 0 : index
    %251 = vector.load %arg10[%c0_94, %c0_95] : memref<1x128xf32, #tpu.memory_space<vmem>>, vector<1x128xf32>
    %252 = vector.broadcast %251 : vector<1x128xf32> to vector<8x128xf32>
    %253 = arith.addf %250, %252 : vector<8x128xf32>
    %254 = vector.shape_cast %253 : vector<8x128xf32> to vector<1x8x128xf32>
    %c0_96 = arith.constant 0 : index
    %c0_97 = arith.constant 0 : index
    %c0_98 = arith.constant 0 : index
    %255 = vector.load %arg11[%c0_96, %c0_97, %c0_98] : memref<1x8x128xf32, #tpu.memory_space<vmem>>, vector<1x8x128xf32>
    tpu.vector_store %arg11[%c0_96, %c0_97, %c0_98], %254 {strides = array<i32>} : memref<1x8x128xf32, #tpu.memory_space<vmem>>, vector<1x8x128xf32>,
    return
  }
  func.func @transform_0(%arg0: i32) -> (i32, i32, i32) {
    %c0_i32 = arith.constant 0 : i32
    %c0_i32_0 = arith.constant 0 : i32
    %c0_i32_1 = arith.constant 0 : i32
    return %arg0, %c0_i32, %c0_i32_0 : i32, i32, i32
  }
  func.func @transform_1(%arg0: i32) -> (i32, i32, i32) {
    %c0_i32 = arith.constant 0 : i32
    %c0_i32_0 = arith.constant 0 : i32
    %c0_i32_1 = arith.constant 0 : i32
    %c0_i32_2 = arith.constant 0 : i32
    return %c0_i32, %c0_i32_0, %c0_i32_1 : i32, i32, i32
  }
  func.func @transform_2(%arg0: i32) -> (i32, i32, i32, i32) {
    %c0_i32 = arith.constant 0 : i32
    %c0_i32_0 = arith.constant 0 : i32
    %c0_i32_1 = arith.constant 0 : i32
    %c0_i32_2 = arith.constant 0 : i32
    %c0_i32_3 = arith.constant 0 : i32
    return %c0_i32, %c0_i32_0, %c0_i32_1, %c0_i32_2 : i32, i32, i32, i32
  }
  func.func @transform_3(%arg0: i32) -> (i32, i32, i32) {
    %c0_i32 = arith.constant 0 : i32
    %c0_i32_0 = arith.constant 0 : i32
    %c0_i32_1 = arith.constant 0 : i32
    %c0_i32_2 = arith.constant 0 : i32
    return %c0_i32, %c0_i32_0, %c0_i32_1 : i32, i32, i32
  }
  func.func @transform_4(%arg0: i32) -> (i32, i32, i32) {
    %c0_i32 = arith.constant 0 : i32
    %c0_i32_0 = arith.constant 0 : i32
    %c0_i32_1 = arith.constant 0 : i32
    %c0_i32_2 = arith.constant 0 : i32
    return %c0_i32, %c0_i32_0, %c0_i32_1 : i32, i32, i32
  }
  func.func @transform_5(%arg0: i32) -> (i32, i32, i32) {
    %c0_i32 = arith.constant 0 : i32
    %c0_i32_0 = arith.constant 0 : i32
    %c0_i32_1 = arith.constant 0 : i32
    %c0_i32_2 = arith.constant 0 : i32
    return %c0_i32, %c0_i32_0, %c0_i32_1 : i32, i32, i32
  }
  func.func @transform_6(%arg0: i32) -> (i32, i32, i32) {
    %c0_i32 = arith.constant 0 : i32
    %c0_i32_0 = arith.constant 0 : i32
    %c0_i32_1 = arith.constant 0 : i32
    %c0_i32_2 = arith.constant 0 : i32
    return %c0_i32, %c0_i32_0, %c0_i32_1 : i32, i32, i32
  }
  func.func @transform_7(%arg0: i32) -> (i32, i32) {
    %c0_i32 = arith.constant 0 : i32
    %c0_i32_0 = arith.constant 0 : i32
    %c0_i32_1 = arith.constant 0 : i32
    return %c0_i32, %c0_i32_0 : i32, i32
  }
  func.func @transform_8(%arg0: i32) -> (i32, i32) {
    %c0_i32 = arith.constant 0 : i32
    %c0_i32_0 = arith.constant 0 : i32
    %c0_i32_1 = arith.constant 0 : i32
    return %c0_i32, %c0_i32_0 : i32, i32
  }
  func.func @transform_9(%arg0: i32) -> (i32, i32) {
    %c0_i32 = arith.constant 0 : i32
    %c0_i32_0 = arith.constant 0 : i32
    %c0_i32_1 = arith.constant 0 : i32
    return %c0_i32, %c0_i32_0 : i32, i32
  }
  func.func @transform_10(%arg0: i32) -> (i32, i32, i32) {
    %c0_i32 = arith.constant 0 : i32
    %c0_i32_0 = arith.constant 0 : i32
    %c0_i32_1 = arith.constant 0 : i32
    return %arg0, %c0_i32, %c0_i32_0 : i32, i32, i32
  }
}

</mosaic_0001>

<bundles_post_ra>
// kernel: tpu_custom_call.1
= control target key start
LH: loop header
LB: loop body
LE: loop exit
PB: predicated region body
PF: predicated region fallthrough
CT: control target
= control target key end

     0   :  { %s3636_s0 = inlined_call_operand.hbm [shape: f32[2,8,32], index: 0, kind: input, shape index: {}]   ;;  %s3637_s1 = inlined_call_operand.vmem [shape: bf16[2,32,128], index: 1, kind: input, shape index: {}]   ;;  %s3638_s2 = inlined_call_operand.vmem [shape: bf16[2,4,8,32], index: 2, kind: input, shape index: {}]   ;;  %s3639_s3 = inlined_call_operand.vmem [shape: bf16[2,32,64], index: 3, kind: input, shape index: {}]   ;;  %s3640_s4 = inlined_call_operand.vmem [shape: bf16[2,64,32], index: 4, kind: input, shape index: {}]   ;;  %s3641_s5 = inlined_call_operand.hbm [shape: f32[2,4,128], index: 5, kind: input, shape index: {}]   ;;  %s3642_s6 = inlined_call_operand.hbm [shape: f32[2,4,32], index: 6, kind: input, shape index: {}]   ;;  %s3643_s7 = inlined_call_operand.vmem [shape: f32[2,32], index: 7, kind: input, shape index: {}]   ;;  %s3644_s8 = inlined_call_operand.hbm [shape: bf16[32,128], index: 8, kind: input, shape index: {}]   ;;  %s3645_s9 = inlined_call_operand.vmem [shape: f32[1,128], index: 9, kind: input, shape index: {}]   ;;  %s3646_s10 = inlined_call_operand.hbm [shape: f32[2,8,128], index: 10, kind: output, shape index: {}]  }
   0x1   :  { %3653 = sst [smem:[#allocation16_spill]] %s3641_s5 }
   0x2   :  { %3654 = sst [smem:[#allocation17_spill]] %s3642_s6 }
   0x3   :  { %3655 = sst [smem:[#allocation18_spill]] %s3644_s8 }
   0x4   :  { %15 = vsyncpa [#allocation3], 0 }
   0x5   :  { %17 = vsyncpa [#allocation3 + $0x1], 0 }
   0x6   :  { %18 = vsyncpa [#allocation6], 0 }
   0x7   :  { %19 = vsyncpa [#allocation9], 0 }
   0x8   :  { %20 = vsyncpa [#allocation4], 0 }
   0x9   :  { %22 = vsyncpa [#allocation4 + $0x1], 0  ;;  %s2963_s13 = smov 0   ;;  %s2965_s14 = smov 0  }
   0xa   :  { %s2967_s15 = smov 0   ;;  %s2969_s16 = smov 0  }
   0xb LB: > { %s3656_s5 = sld [smem:[#allocation16_spill]]  ;;  %s2987_s20 = sadd.s32 4294967295, %s2886_s16   ;;  %s2886_s16 = sphi %s2969_s16, %s3677_s16   ;;  %s2882_s15 = sphi %s2967_s15, %s3676_s15   ;;  %s2878_s14 = sphi %s2965_s14, %s3675_s14   ;;  %s2874_s13 = sphi %s2963_s13, %s3674_s13  }
   0xc   : > { %p2380_p0 = scmp.ge.s32.totalorder %s2886_s16, 1  ;;  %p49_p1 = scmp.eq.s32.totalorder %s2987_s20, 0 }
   0xd   : > { %p274_p2 = scmp.lt.s32.totalorder %s2886_s16, 3  ;;  %s2888_s22 = smov [#allocation5]  }
   0xe   : > { %s299_s23 = sshll.u32 %s2888_s22, 4  ;;  %s3658_s6 = sld [smem:[#allocation17_spill]]  ;;  %s300_s23 = int_to_ptr.vmem [resolvable:$true] %s299_s23 }
   0xf   : > { %p2992_p3 = pnand %p2380_p0, %p274_p2  ;;  %s3660_s8 = sld [smem:[#allocation18_spill]] }
  0x10   : > { %s2889_s11 = smov [#allocation7]   ;;  %s2890_s17 = smov 64  }
  0x11   : > { %s297_s19 = sshll.u32 %s3656_s5, 4  ;;  %p2563_p4 = pneg %p2992_p3  ;;  %s298_s19 = int_to_ptr.hbm [resolvable:$true] %s297_s19 }
  0x12   : > { %s313_s12 = sshll.u32 %s2889_s11, 4  ;;  %s2891_s18 = smov 4   ;;  %s314_s12 = int_to_ptr.vmem [resolvable:$true] %s313_s12 }
  0x13   : > { %p3004_p6 = pnand %p2563_p4, %p49_p1  ;;  %s2892_s22 = smov [#allocation8]  }
  0x14   : > { %s311_s26 = sshll.u32 %s3658_s6, 4  ;;  %s330_s24 = sshll.u32 %s2892_s22, 4  ;;  %s312_s26 = int_to_ptr.hbm [resolvable:$true] %s311_s26  ;;  %s331_s24 = int_to_ptr.vmem [resolvable:$true] %s330_s24 }
  0x15   : > { %s328_s30 = sshll.u32 %s3660_s8, 4  ;;  %s2379_s25 = sadd.s32 4294967294, %s2886_s16   ;;  %s329_s30 = int_to_ptr.hbm [resolvable:$true] %s328_s30 }
  0x16   : > { %2566 = dma.hbm_to_vmem [thread:$0]  (!%p3004_p6), %s298_s19, 128, %s300_s23, [#allocation6], %s2890_s17, %s2890_s17, %s2891_s18  }
  0x17   : > { %2569 = dma.hbm_to_vmem [thread:$0]  (!%p3004_p6), %s312_s26, 128, %s314_s12, [#allocation6], %s2890_s17, %s2890_s17, %s2891_s18  }
  0x18   : > { %2572 = dma.hbm_to_vmem [thread:$0]  (!%p3004_p6), %s329_s30, 256, %s331_s24, [#allocation9], %s2890_s17, %s2890_s17, %s2891_s18  }
  0x19   : > { %s3019_s28 = sadd.s32 1, %s2886_s16   ;;  %s35_s29 = sadd.s32 1, %s2882_s15 }
  0x1a   : > { %s32_s19 = ssub.s32 %s2886_s16, %s3019_s28  ;;  %p42_p7 = scmp.ne.s32.totalorder %s2882_s15, %s2878_s14 }
  0x1b   : > { %p33_p8 = scmp.eq.s32.totalorder %s32_s19, 0  ;;  %p43_p9 = scmp.eq.s32.totalorder %s2886_s16, 0 }
  0x1c   : > { %p48_p10 = scmp.ne.s32.totalorder %s2878_s14, %s2874_s13  ;;  %p261_p11 = scmp.eq.s32.totalorder %s2987_s20, 1 }
  0x1d   : > { %s3031_s23 = scalar_select %p33_p8, %s2882_s15, %s35_s29  }
  0x1e   : > { %p3035_p12 = por %p49_p1, %p48_p10  ;;  %p3039_p13 = por %p261_p11, %p42_p7 }
  0x1f   : > { %3661 = sst [smem:[#allocation15_spill]] %s3031_s23  ;;  %p267_p0 = scmp.eq.s32.totalorder %s2379_s25, 1 }
  0x20   : > { %p44_p2 = por %p43_p9, %p42_p7  ;;  %s347_s30 = sand.u32 1, %s2882_s15  }
  0x21   : > { %p3044_p4 = por %p267_p0, %p48_p10  ;;  %p2584_p6 = scmp.lt.s32.totalorder %s2886_s16, 2 }
  0x22   : > { %s2385_s12 = sshll.u32 %s347_s30, 3  ;;  %s2386_s17 = sshll.u32 %s2886_s16, 3 }
  0x23   : > { %s355_s24 = scalar_lea.hbm %s3636_s0, %s2386_s17  ;;  %s351_s19 = scalar_lea.vmem [#allocation2], %s2385_s12 }
  0x24   : > { %s357_s29 = sshll.u32 %s355_s24, 4  ;;  %s359_s5 = sshll.u32 %s351_s19, 4  ;;  %s358_s29 = int_to_ptr.hbm [resolvable:$true] %s357_s29  ;;  %s360_s5 = int_to_ptr.vmem [resolvable:$true] %s359_s5 }
  0x25   : > { %p3053_p8 = pnand %p2584_p6, %p44_p2  ;;  %s348_s6 = scalar_lea.sflag [#allocation3], %s347_s30 }
  0x26   : > { %s2782_s8 = sshra.s32 %s358_s29, 4  ;;  %s2789_s12 = scalar_lea.hbm %s3636_s0, 16  ;;  %s2783_s8 = int_to_ptr.hbm [resolvable:$true] %s2782_s8 }
  0x27   : > { %s2784_s23 = scalar_lea.hbm %s2783_s8, 8  ;;  %p2786_p9 = pneg %p3053_p8 }
  0x28   : > { %p2785_p7 = scmp.ne.s32.totalorder %s2783_s8, %s2784_s23  ;;  %p2790_p0 = scmp.lt.s32.totalorder %s2783_s8, %s3636_s0 }
  0x29   : > { %p2791_p2 = scmp.lt.s32.totalorder %s2789_s12, %s2784_s23 }
  0x2a   : > { %p2787_p10 = pnand %p2786_p9, %p2785_p7 }
  0x2b   : > { %p2792_p6 = por %p2791_p2, %p2790_p0 }
  0x2c   : > { %p2788_p11 = pneg %p2787_p10 }
  0x2e   : > { %p2793_p5 = pnand %p2792_p6, %p2788_p11 }
  0x30   : > { %2796 = shalt.err (!%p2793_p5)
}
  0x31   : > { %2576 = dma.hbm_to_vmem [thread:$0]  (!%p3053_p8), %s358_s29, 128, %s360_s5, %s348_s6  }
  0x32   : > { %368 = sbr.rel (%p2992_p3) target bundleno = 3811 (0xee3), region = 60  ;;  %s3070_s30 = sand.u32 (!%p2992_p3), 1, %s2878_s14  }
  0x33   : > { %s3647_s19 = sshll.u32 (!%p2992_p3), %s3070_s30, 3  ;;  %s371_s17 = scalar_lea.sflag (!%p2992_p3), [#allocation3], %s3070_s30 }
  0x34   : > { %s374_s8 = scalar_lea.vmem (!%p2992_p3), [#allocation2], %s3647_s19 }
  0x37   : > { %2857 = dma.done.wait (%p3035_p12), %s371_s17, 128  }
  0x38   : > { %2859 = vsyncadd (%p3035_p12), %s371_s17, 4294967168 }
  0x39   : > { %2861 = dma.done.wait (%p49_p1), [#allocation6], 256  }
  0x3a   : > { %2863 = vsyncadd (%p49_p1), [#allocation6], 4294967040 }
  0x3b   : > { %2865 = dma.done.wait (%p49_p1), [#allocation9], 256  }
  0x3c   : > { %2867 = vsyncadd (%p49_p1), [#allocation9], 4294967040  ;;  %vm438_vm0 = vcmask 261120   ;;  %v3088_v0 = vld [vmem:[%s374_s8] sm:$0xff]  ;;  %v2893_v2 = vmov 32.0   ;;  %s2894_s26 = smov 96  }
  0x3d   : > { %v439_v1 = vsel %vm438_vm0, %v3088_v0, 0.0  ;;  %2644 = vrcp.f32 %v2893_v2  ;;  %v2530_v14 = vld [vmem:[%s3637_s1 + $0x8] sm:$0xff]  ;;  %v2529_v15 = vld [vmem:[%s3637_s1] sm:$0xff]  ;;  %v3104_v24 = vld [vmem:[#allocation7] sm:$0xf]  ;;  %s2895_s29 = smov 88  }
  0x3e   : > { %440 = vadd.xlane.f32.xlu0 %v439_v1  ;;  %499 = vmatpush.bf16.msra.mxu0 %v2530_v14  ;;  %v468_v26 = vperm.slane %v3104_v24, 0  ;;  %v470_v29 = vperm.slane %v3104_v24, 1  ;;  %v3109_v33 = vld [vmem:[#allocation5] sm:$0xf]  ;;  %s2896_s25 = smov 120   ;;  %s2897_s18 = smov 112  }
  0x3f   : > { %v477_v34 = vperm.slane %v3109_v33, 0  ;;  %s2898_s12 = smov 104   ;;  %s3651_s22 = smov 80   ;;  %v2905_v42 = vmov 1983009808   ;;  %vm541_vm5 = vcmask 1047556  }
  0x40   : > { %s2900_s24 = smov 72   ;;  %s3648_s17 = smov 56   ;;  %v546_v43 = vunpack.c.l.s4 %v2905_v42  ;;  %v2906_v57 = vmov 1934713408   ;;  %vm875_vm6 = vcmask 64512   ;;  %vm1115_vm8 = vcmask 1043456  }
  0x41   : > { %s3652_s8 = smov 64   ;;  %s3649_s5 = smov 40   ;;  %v594_v58 = vunpack.c.l.s4 %v2906_v57  ;;  %vm1302_vm12 = vcmask 523264  }
  0x42   : > { %500 = vmatpush.bf16.msra.mxu0 %v2529_v15  ;;  %s3650_s6 = smov 48   ;;  %v3123_v47 = vunpack.c.0.s8 %v546_v43  ;;  %s3666_s19 = smov 64  }
  0x43   : > { %v2645_v3 = vpop.eup %2644 }
  0x44   : > { %v443_v4 = vmul.f32 32.0, %v2645_v3  ;;  %vm447_vm1 = vweird.f32 %v2645_v3 }
  0x46   : > { %v444_v5 = vsub.f32 1.0, %v443_v4 }
  0x48   : > { %v445_v6 = vmul.f32 %v2645_v3, %v444_v5 }
  0x4a   : > { %v446_v7 = vadd.f32 %v2645_v3, %v445_v6 }
  0x4c   : > { %v3092_v8 = vsel %vm447_vm1, %v2645_v3, %v446_v7 }
  0xb1   : > { %v441_v9 = vpop.xlane.xlu0 %440 }
  0xb2   : > { %v449_v10 = vmul.f32 %v3092_v8, %v441_v9 }
  0xb4   : > { %v450_v11 = vsub.f32 %v3088_v0, %v449_v10 }
  0xb6   : > { %v451_v12 = vmul.f32 %v450_v11, %v450_v11 }
  0xb8   : > { %v452_v13 = vsel %vm438_vm0, %v451_v12, 0.0 }
  0xb9   : > { %453 = vadd.xlane.f32.xlu0 %v452_v13 }
 0x12c   : > { %v454_v16 = vpop.xlane.xlu0 %453 }
 0x12d   : > { %v455_v17 = vmul.f32 %v454_v16, %v3092_v8 }
 0x12f   : > { %v456_v18 = vadd.f32 1e-05, %v455_v17 }
 0x131   : > { %2646 = vrsqrt.f32 %v456_v18  ;;  %vm463_vm3 = vweird.f32 %v456_v18 }
 0x137   : > { %v2647_v19 = vpop.eup %2646 }
 0x138   : > { %v458_v20 = vmul.f32 %v2647_v19, %v456_v18  ;;  %vm464_vm2 = vweird.f32 %v2647_v19 }
 0x139   : > { %vm465_vm4 = vmor %vm463_vm3, %vm464_vm2 }
 0x13a   : > { %v459_v21 = vmul.f32 %v2647_v19, %v458_v20 }
 0x13c   : > { %v460_v22 = vmul.f32 0.5, %v459_v21 }
 0x13e   : > { %v461_v23 = vsub.f32 1.5, %v460_v22 }
 0x140   : > { %v462_v25 = vmul.f32 %v2647_v19, %v461_v23 }
 0x142   : > { %v466_v27 = vsel %vm465_vm4, %v2647_v19, %v462_v25 }
 0x143   : > { %v467_v28 = vmul.f32 %v466_v27, %v450_v11  ;;  %v3136_v11 = vunpack.c.0.s8 %v594_v58 }
 0x145   : > { %v469_v30 = vmul.f32 %v468_v26, %v467_v28 }
 0x147   : > { %v471_v31 = vadd.f32 %v470_v29, %v469_v30 }
 0x149   : > { %v472_v32 = vpack.c.bf16 %v471_v31, %v471_v31 }
 0x14b   : > { %2402 = vmatmul.msk.bf16.vlgmr.msra.gmra.mxu0 %vm438_vm0, %v472_v32 }
 0x1c8   : > { %v502_v35 = vpop.f32.mrf.mxu0 }
 0x1c9   : > { %v503_v36 = vadd.f32 %v502_v35, %v477_v34 }
 0x1cb   : > { %516 = vrot.lane.b32.xlu0 %v503_v36, %s2894_s26  ;;  %519 = vrot.lane.b32.xlu2 %v503_v36, %s2895_s29  ;;  %v543_v46 = vrot.slane %v503_v36, 4 }
 0x1cc   : > { %507 = vrot.lane.b32.xlu1 %v503_v36, %s2896_s25 }
 0x1d0   : > { %v504_v37 = vpop.f32.mrf.mxu0 }
 0x1d3   : > { %510 = vrot.lane.b32.xlu2 %v503_v36, %s2897_s18 }
 0x1d4   : > { %513 = vrot.lane.b32.xlu1 %v503_v36, %s2898_s12 }
 0x1db   : > { %522 = vrot.lane.b32.xlu2 %v503_v36, %s3651_s22  ;;  %s3667_s22 = smov 80  }
 0x1dc   : > { %525 = vrot.lane.b32.xlu1 %v503_v36, %s2900_s24 }
 0x1e3   : > { %531 = vrot.lane.b32.xlu2 %v503_v36, %s3648_s17  ;;  %s3668_s17 = smov 48  }
 0x1e4   : > { %528 = vrot.lane.b32.xlu1 %v503_v36, %s3652_s8  ;;  %s3669_s8 = smov 40  }
 0x1eb   : > { %537 = vrot.lane.b32.xlu2 %v503_v36, %s3649_s5 }
 0x1ec   : > { %534 = vrot.lane.b32.xlu1 %v503_v36, %s3650_s6  ;;  %s2265_s6 = scalar_lea.sflag [#allocation4], %s3070_s30 }
 0x225   : > { %v520_v38 = vpop.permute.xlu2 %519 }
 0x226   : > { %v579_v16 = vrot.slane %v520_v38, 4 }
 0x22d   : > { %v511_v39 = vpop.permute.xlu2 %510 }
 0x22e   : > { %v540_v45 = vrot.slane %v511_v39, 4  ;;  %v544_v49 = vsel %vm541_vm5, %v511_v39, %v543_v46 }
 0x22f   : > { %v552_v54 = vperm.slane %v544_v49, %v3123_v47 }
 0x230   : > { %v542_v50 = vsel %vm541_vm5, %v540_v45, %v503_v36 }
 0x231   : > { %v548_v56 = vperm.slane %v542_v50, %v3123_v47  ;;  %v603_v4 = vrot.slane %v552_v54, 4 }
 0x233   : > { %v591_v7 = vrot.slane %v548_v56, 4 }
 0x235   : > { %v523_v40 = vpop.permute.xlu2 %522 }
 0x236   : > { %v565_v63 = vrot.slane %v523_v40, 4 }
 0x23d   : > { %v532_v41 = vpop.permute.xlu2 %531  ;;  %v517_v48 = vpop.permute.xlu0 %516 }
 0x23e   : > { %v508_v44 = vpop.permute.xlu1 %507  ;;  %v567_v51 = vrot.slane %v517_v48, 4  ;;  %v667_v2 = vrot.slane %v532_v41, 4  ;;  %v566_v9 = vsel %vm541_vm5, %v565_v63, %v517_v48 }
 0x23f   : > { %v555_v52 = vrot.slane %v508_v44, 4  ;;  %v572_v18 = vperm.slane %v566_v9, %v3123_v47 }
 0x240   : > { %v568_v1 = vsel %vm541_vm5, %v523_v40, %v567_v51 }
 0x241   : > { %v576_v12 = vperm.slane %v568_v1, %v3123_v47  ;;  %v615_v35 = vrot.slane %v572_v18, 4 }
 0x243   : > { %v627_v27 = vrot.slane %v576_v12, 4 }
 0x245   : > { %v538_v53 = vpop.permute.xlu2 %537 }
 0x246   : > { %v514_v55 = vpop.permute.xlu1 %513  ;;  %v665_v61 = vrot.slane %v538_v53, 4  ;;  %v668_v10 = vsel %vm541_vm5, %v538_v53, %v667_v2 }
 0x247   : > { %v553_v59 = vrot.slane %v514_v55, 4  ;;  %v556_v60 = vsel %vm541_vm5, %v514_v55, %v555_v52  ;;  %v3144_v19 = vperm.slane %v668_v10, %v3123_v47 }
 0x248   : > { %v564_v62 = vperm.slane %v556_v60, %v3123_v47  ;;  %v666_v13 = vsel %vm541_vm5, %v665_v61, %v532_v41 }
 0x249   : > { %v554_v3 = vsel %vm541_vm5, %v553_v59, %v508_v44  ;;  %v3149_v23 = vperm.slane %v666_v13, %v3123_v47  ;;  %v689_v36 = vrot.slane %v3144_v19, 4 }
 0x24a   : > { %v560_v5 = vperm.slane %v554_v3, %v3123_v47  ;;  %v601_v6 = vrot.slane %v564_v62, 4  ;;  %v604_v15 = vsel %vm541_vm5, %v564_v62, %v603_v4 }
 0x24b   : > { %v612_v25 = vperm.slane %v604_v15, %v3136_v11  ;;  %v677_v39 = vrot.slane %v3149_v23, 4 }
 0x24c   : > { %v589_v14 = vrot.slane %v560_v5, 4  ;;  %v592_v17 = vsel %vm541_vm5, %v560_v5, %v591_v7  ;;  %v602_v21 = vsel %vm541_vm5, %v601_v6, %v552_v54 }
 0x24d   : > { %v600_v28 = vperm.slane %v592_v17, %v3136_v11  ;;  %v608_v31 = vperm.slane %v602_v21, %v3136_v11  ;;  %v651_v40 = vrot.slane %v612_v25, 4 }
 0x24e   : > { %v590_v20 = vsel %vm541_vm5, %v589_v14, %v548_v56  ;;  %v526_v22 = vpop.permute.xlu1 %525 }
 0x24f   : > { %v577_v26 = vrot.slane %v526_v22, 4  ;;  %v580_v29 = vsel %vm541_vm5, %v526_v22, %v579_v16  ;;  %v596_v30 = vperm.slane %v590_v20, %v3136_v11  ;;  %v643_v43 = vrot.slane %v600_v28, 4 }
 0x250   : > { %v588_v34 = vperm.slane %v580_v29, %v3123_v47  ;;  %v647_v48 = vrot.slane %v608_v31, 4 }
 0x251   : > { %v578_v32 = vsel %vm541_vm5, %v577_v26, %v520_v38  ;;  %v639_v38 = vrot.slane %v596_v30, 4 }
 0x252   : > { %v584_v37 = vperm.slane %v578_v32, %v3123_v47  ;;  %v625_v41 = vrot.slane %v588_v34, 4  ;;  %v628_v42 = vsel %vm541_vm5, %v588_v34, %v627_v27 }
 0x253   : > { %v636_v46 = vperm.slane %v628_v42, %v3136_v11 }
 0x254   : > { %v613_v44 = vrot.slane %v584_v37, 4  ;;  %v616_v45 = vsel %vm541_vm5, %v584_v37, %v615_v35  ;;  %v626_v50 = vsel %vm541_vm5, %v625_v41, %v576_v12 }
 0x255   : > { %v624_v49 = vperm.slane %v616_v45, %v3136_v11  ;;  %v632_v52 = vperm.slane %v626_v50, %v3136_v11  ;;  %v649_v53 = vrot.slane %v636_v46, 4  ;;  %v652_v54 = vsel %vm541_vm5, %v636_v46, %v651_v40 }
 0x256   : > { %v614_v51 = vsel %vm541_vm5, %v613_v44, %v572_v18  ;;  %v529_v55 = vpop.permute.xlu1 %528  ;;  %v745_v58 = vrot.slane %v652_v54, 4 }
 0x257   : > { %v620_v56 = vperm.slane %v614_v51, %v3136_v11  ;;  %v641_v57 = vrot.slane %v624_v49, 4  ;;  %v655_v59 = vrot.slane %v529_v55, 4  ;;  %v645_v60 = vrot.slane %v632_v52, 4 }
 0x258   : > { %v648_v61 = vsel %vm541_vm5, %v632_v52, %v647_v48  ;;  %v650_v62 = vsel %vm541_vm5, %v649_v53, %v612_v25  ;;  %v644_v63 = vsel %vm541_vm5, %v624_v49, %v643_v43 }
 0x259   : > { %v637_v1 = vrot.slane %v620_v56, 4  ;;  %v640_v2 = vsel %vm541_vm5, %v620_v56, %v639_v38  ;;  %v733_v3 = vrot.slane %v650_v62, 4  ;;  %v746_v4 = vsel %vm541_vm5, %v745_v58, %v648_v61 }
 0x25a   : > { %v646_v5 = vsel %vm541_vm5, %v645_v60, %v608_v31  ;;  %v747_v6 = vrot.slane %v648_v61, 4  ;;  %v642_v7 = vsel %vm541_vm5, %v641_v57, %v600_v28  ;;  %v721_v9 = vrot.slane %v644_v63, 4 }
 0x25b   : > { %v735_v10 = vrot.slane %v646_v5, 4  ;;  %v638_v12 = vsel %vm541_vm5, %v637_v1, %v596_v30  ;;  %v709_v13 = vrot.slane %v642_v7, 4  ;;  %v723_v14 = vrot.slane %v640_v2, 4 }
 0x25c   : > { %v748_v15 = vsel %vm541_vm5, %v652_v54, %v747_v6  ;;  %v711_v16 = vrot.slane %v638_v12, 4  ;;  %v722_v17 = vsel %vm541_vm5, %v721_v9, %v640_v2  ;;  %v734_v18 = vsel %vm541_vm5, %v733_v3, %v646_v5 }
 0x25d   : > { %v724_v20 = vsel %vm541_vm5, %v644_v63, %v723_v14  ;;  %v736_v21 = vsel %vm541_vm5, %v650_v62, %v735_v10  ;;  %v756_v22 = vperm.slane %v748_v15, %v3123_v47  ;;  %v710_v25 = vsel %vm541_vm5, %v709_v13, %v638_v12 }
 0x25e   : > { %v535_v26 = vpop.permute.xlu1 %534  ;;  %v712_v27 = vsel %vm541_vm5, %v642_v7, %v711_v16  ;;  %v732_v28 = vperm.slane %v724_v20, %v3123_v47  ;;  %v744_v29 = vperm.slane %v736_v21, %v3123_v47  ;;  %v3189_v30 = vperm.slane %v710_v25, %v3123_v47 }
 0x25f   : > { %v653_v31 = vrot.slane %v535_v26, 4  ;;  %v656_v32 = vsel %vm541_vm5, %v535_v26, %v655_v59  ;;  %v720_v34 = vperm.slane %v712_v27, %v3123_v47  ;;  %v793_v35 = vrot.slane %v756_v22, 4 }
 0x260   : > { %v664_v37 = vperm.slane %v656_v32, %v3123_v47  ;;  %v769_v40 = vrot.slane %v732_v28, 4  ;;  %v795_v41 = vrot.slane %v744_v29, 4  ;;  %v728_v42 = vperm.slane %v722_v17, %v3123_v47 }
 0x261   : > { %v654_v43 = vsel %vm541_vm5, %v653_v31, %v529_v55  ;;  %v794_v44 = vsel %vm541_vm5, %v793_v35, %v744_v29  ;;  %v771_v45 = vrot.slane %v720_v34, 4  ;;  %v740_v46 = vperm.slane %v734_v18, %v3123_v47 }
 0x262   : > { %v660_v38 = vperm.slane %v654_v43, %v3123_v47  ;;  %v690_v48 = vsel %vm541_vm5, %v689_v36, %v664_v37  ;;  %v691_v49 = vrot.slane %v664_v37, 4  ;;  %v770_v50 = vsel %vm541_vm5, %v769_v40, %v720_v34 }
 0x263   : > { %v696_v51 = vperm.slane %v690_v48, %v3136_v11  ;;  %v776_v52 = vperm.slane %v770_v50, %v3136_v11  ;;  %v800_v53 = vperm.slane %v794_v44, %v3136_v11  ;;  %v772_v54 = vsel %vm541_vm5, %v732_v28, %v771_v45 }
 0x264   : > { %v678_v55 = vsel %vm541_vm5, %v677_v39, %v660_v38  ;;  %v679_v56 = vrot.slane %v660_v38, 4  ;;  %v692_v57 = vsel %vm541_vm5, %v3144_v19, %v691_v49  ;;  %v780_v36 = vperm.slane %v772_v54, %v3136_v11 }
 0x265   : > { %v684_v58 = vperm.slane %v678_v55, %v3136_v11  ;;  %v700_v59 = vperm.slane %v692_v57, %v3136_v11  ;;  %v705_v60 = vrot.slane %v696_v51, 4  ;;  %v813_v61 = vrot.slane %v800_v53, 4 }
 0x266   : > { %v680_v62 = vsel %vm541_vm5, %v3149_v23, %v679_v56  ;;  %v815_v63 = vrot.slane %v776_v52, 4  ;;  %v796_v1 = vsel %vm541_vm5, %v756_v22, %v795_v41  ;;  %v752_v39 = vperm.slane %v746_v4, %v3123_v47 }
 0x267   : > { %v688_v2 = vperm.slane %v680_v62, %v3136_v11  ;;  %v701_v3 = vrot.slane %v684_v58, 4  ;;  %v706_v19 = vsel %vm541_vm5, 0.0, %v705_v60  ;;  %v707_v5 = vrot.slane %v700_v59, 4 }
 0x268   : > { %v814_v6 = vsel %vm541_vm5, %v813_v61, %v776_v52  ;;  %v816_v7 = vsel %vm541_vm5, %v800_v53, %v815_v63  ;;  %v804_v9 = vperm.slane %v796_v1, %v3136_v11  ;;  %v757_v10 = vrot.slane %v728_v42, 4 }
 0x269   : > { %v703_v12 = vrot.slane %v688_v2, 4  ;;  %v708_v23 = vsel %vm541_vm5, 0.0, %v707_v5  ;;  %v832_v13 = vsel %vm541_vm5, %v707_v5, %v696_v51  ;;  %2403 = vmatpush.xpose.msk.msrb.mxu0 %vm875_vm6, %v814_v6  ;;  %2405 = vmatpush.xpose.msk.msra.mxu2 %vm875_vm6, %v816_v7  ;;  %v781_v4 = vrot.slane %v752_v39, 4 }
 0x26a   : > { %v836_v14 = vperm.slane %v832_v13, %v3123_v47  ;;  %v837_v15 = vrot.slane %v708_v23, 4  ;;  %v817_v16 = vrot.slane %v804_v9, 4  ;;  %v758_v17 = vsel %vm541_vm5, %v757_v10, %v3189_v30 }
 0x26b   : > { %v764_v18 = vperm.slane %v758_v17, %v3136_v11  ;;  %v782_v20 = vsel %vm541_vm5, %v781_v4, %v740_v46  ;;  %v819_v21 = vrot.slane %v780_v36, 4  ;;  %v759_v22 = vrot.slane %v3189_v30, 4 }
 0x26c   : > { %v818_v25 = vsel %vm541_vm5, %v817_v16, %v780_v36  ;;  %v788_v26 = vperm.slane %v782_v20, %v3136_v11  ;;  %v783_v27 = vrot.slane %v740_v46, 4  ;;  %v702_v28 = vsel %vm541_vm5, 0.0, %v701_v3 }
 0x26d   : > { %2407 = vmatpush.xpose.msk.msra.mxu3 %vm875_vm6, %v818_v25  ;;  %v820_v29 = vsel %vm541_vm5, %v804_v9, %v819_v21  ;;  %v807_v31 = vrot.slane %v764_v18, 4  ;;  %v760_v32 = vsel %vm541_vm5, %v728_v42, %v759_v22  ;;  %v704_v34 = vsel %vm541_vm5, 0.0, %v703_v12 }
 0x26e   : > { %v805_v35 = vrot.slane %v788_v26, 4  ;;  %2409 = vmatpush.xpose.msk.msra.mxu1 %vm875_vm6, %v820_v29  ;;  %v768_v30 = vperm.slane %v760_v32, %v3136_v11  ;;  %v784_v37 = vsel %vm541_vm5, %v752_v39, %v783_v27  ;;  %v821_v40 = vsel %vm541_vm5, %v703_v12, %v684_v58 }
 0x26f   : > { %v808_v41 = vsel %vm541_vm5, %v788_v26, %v807_v31  ;;  %v792_v43 = vperm.slane %v784_v37, %v3136_v11  ;;  %v825_v44 = vperm.slane %v821_v40, %v3123_v47  ;;  %v826_v45 = vrot.slane %v704_v34, 4 }
 0x270   : > { %v806_v42 = vsel %vm541_vm5, %v805_v35, %v764_v18  ;;  %2406 = vmatmul.msk.f32.vlgmr.msra.gmra.mxu2 %vm875_vm6, %v808_v41  ;;  %v811_v46 = vrot.slane %v768_v30, 4  ;;  %v838_v38 = vsel %vm541_vm5, %v837_v15, %v706_v19  ;;  %v857_v48 = vrot.slane %v836_v14, 4 }
 0x271   : > { %2404 = vmatmul.msk.f32.vlgmr.msrb.gmra.mxu0 %vm875_vm6, %v806_v42  ;;  %v809_v49 = vrot.slane %v792_v43, 4  ;;  %v827_v50 = vsel %vm541_vm5, %v826_v45, %v702_v28  ;;  %v842_v51 = vperm.slane %v838_v38, %v3123_v47  ;;  %v845_v52 = vrot.slane %v825_v44, 4 }
 0x272   : > { %v812_v53 = vsel %vm541_vm5, %v792_v43, %v811_v46  ;;  %v831_v54 = vperm.slane %v827_v50, %v3123_v47  ;;  %v429_v10 = vlaneseq  ;;  %v2907_v18 = vmov 0.0  }
 0x273   : > { %v810_v55 = vsel %vm541_vm5, %v809_v49, %v768_v30  ;;  %2410 = vmatmul.msk.f32.vlgmr.msra.gmra.mxu1 %vm875_vm6, %v812_v53  ;;  %v858_v56 = vsel %vm541_vm5, %v842_v51, %v857_v48  ;;  %v855_v57 = vrot.slane %v842_v51, 4  ;;  %v1108_v53 = vld [vmem:[%s3638_s2] sm:$0xf] }
 0x274   : > { %2408 = vmatmul.msk.f32.vlgmr.msra.gmra.mxu3 %vm875_vm6, %v810_v55  ;;  %v846_v36 = vsel %vm541_vm5, %v831_v54, %v845_v52  ;;  %v866_v58 = vperm.slane %v858_v56, %v3136_v11  ;;  %v843_v59 = vrot.slane %v831_v54, 4  ;;  %v430_v23 = vshrl.u32 %v429_v10, 7  ;;  %v1110_v55 = vld [vmem:[%s3638_s2 + $0x8] sm:$0xf] }
 0x275   : > { %v854_v60 = vperm.slane %v846_v36, %v3136_v11  ;;  %v856_v61 = vsel %vm541_vm5, %v855_v57, %v836_v14  ;;  %v432_v13 = vand.u32 127, %v429_v10  ;;  %v1117_v54 = vsel %vm1115_vm8, %v1108_v53, 0  ;;  %v1109_v57 = vld [vmem:[%s3638_s2 + $0x4] sm:$0xf]  ;;  %v1111_v36 = vld [vmem:[%s3638_s2 + $0xc] sm:$0xf] }
 0x276   : > { %v871_v62 = vrot.slane %v866_v58, 4  ;;  %v844_v63 = vsel %vm541_vm5, %v843_v59, %v825_v44  ;;  %v862_v1 = vperm.slane %v856_v61, %v3136_v11  ;;  %v1155_v56 = vsel %vm1115_vm8, %v1110_v55, 0  ;;  %v2536_v53 = vld [vmem:[%s3640_s4 + $0x18] sm:$0xff]  ;;  %v2534_v55 = vld [vmem:[%s3640_s4 + $0x8] sm:$0xff] }
 0x277   : > { %v873_v39 = vrot.slane %v854_v60, 4  ;;  %v850_v2 = vperm.slane %v844_v63, %v3136_v11  ;;  %vm433_vm7 = vcmp.le.s32.totalorder %v432_v13, %v430_v23  ;;  %v1174_v59 = vsel %vm1115_vm8, %v1111_v36, 0 }
 0x278   : > { %v872_v3 = vsel %vm541_vm5, %v871_v62, %v854_v60  ;;  %v867_v19 = vrot.slane %v862_v1, 4  ;;  %v3271_v20 = vsel %vm433_vm7, 1.0, %v2907_v18  ;;  %v1197_v18 = vperm.slane %v3109_v33, 1 }
 0x279   : > { %1076 = vmatpush.msrb.mxu1 %v872_v3  ;;  %v874_v5 = vsel %vm541_vm5, %v866_v58, %v873_v39  ;;  %v869_v6 = vrot.slane %v850_v2, 4  ;;  %v1136_v58 = vsel %vm1115_vm8, %v1109_v57, 0 }
 0x27a   : > { %v868_v7 = vsel %vm541_vm5, %v867_v19, %v850_v2  ;;  %1145 = vmatpush.bf16.msra.mxu0 %v1136_v58 }
 0x27b   : > { %1030 = vmatpush.msrb.mxu2 %v868_v7  ;;  %v870_v9 = vsel %vm541_vm5, %v862_v1, %v869_v6  ;;  %1164 = vmatpush.bf16.msra.mxu1 %v1155_v56  ;;  %v1230_v56 = vperm.slane %v3109_v33, 2 }
 0x27c   : > { %1053 = vmatpush.msrb.mxu3 %v870_v9 }
 0x27d   : > { %1099 = vmatpush.msra.mxu2 %v874_v5 }
 0x27e   : > { %1126 = vmatpush.bf16.msra.mxu3 %v1117_v54  ;;  %1310 = vmatpush.bf16.msrb.mxu0 %v2536_v53  ;;  %v2535_v54 = vld [vmem:[%s3640_s4 + $0x10] sm:$0xff] }
 0x282   : > { %1311 = vmatpush.bf16.msrb.mxu0 %v2535_v54 }
 0x286   : > { %1312 = vmatpush.bf16.msrb.mxu0 %v2534_v55 }
 0x2ee   : > { %v899_v12 = vpop.f32.mrf.mxu0 }
 0x2ef   : > { %v980_v4 = vmul.f32 1.442695, %v899_v12 }
 0x2f0   : > { %v977_v14 = vpop.f32.mrf.mxu1 }
 0x2f1   : > { %2648 = vpow2.f32 %v980_v4  ;;  %v986_v15 = vmul.f32 1.442695, %v977_v14 }
 0x2f3   : > { %2650 = vpow2.f32 %v986_v15  ;;  %v925_v16 = vpop.f32.mrf.mxu2 }
 0x2f4   : > { %v982_v17 = vmul.f32 1.442695, %v925_v16 }
 0x2f6   : > { %2652 = vpow2.f32 %v982_v17 }
 0x2f7   : > { %v2649_v21 = vpop.eup %2648  ;;  %v951_v22 = vpop.f32.mrf.mxu3 }
 0x2f8   : > { %v984_v25 = vmul.f32 1.442695, %v951_v22  ;;  %v988_v26 = vmul.f32 %v2649_v21, %v3271_v20 }
 0x2f9   : > { %v2651_v27 = vpop.eup %2650 }
 0x2fa   : > { %2654 = vpow2.f32 %v984_v25  ;;  %v992_v28 = vsel %vm875_vm6, %v988_v26, 0.0  ;;  %v991_v29 = vmul.f32 %v2651_v27, %v3271_v20 }
 0x2fb   : > { %993 = vadd.xlane.f32.xlu0 %v992_v28 }
 0x2fc   : > { %v2653_v31 = vpop.eup %2652  ;;  %v1001_v32 = vsel %vm875_vm6, %v991_v29, 0.0 }
 0x2fd   : > { %1002 = vadd.xlane.f32.xlu1 %v1001_v32  ;;  %v989_v34 = vmul.f32 %v2653_v31, %v3271_v20 }
 0x2ff   : > { %v995_v35 = vsel %vm875_vm6, %v989_v34, 0.0 }
 0x300   : > { %v2655_v30 = vpop.eup %2654  ;;  %996 = vadd.xlane.f32.xlu2 %v995_v35 }
 0x301   : > { %v990_v37 = vmul.f32 %v2655_v30, %v3271_v20 }
 0x303   : > { %v998_v40 = vsel %vm875_vm6, %v990_v37, 0.0 }
 0x304   : > { %999 = vadd.xlane.f32.xlu0 %v998_v40 }
 0x36e   : > { %v994_v41 = vpop.xlane.xlu0 %993 }
 0x36f   : > { %2656 = vrcp.f32 %v994_v41 }
 0x370   : > { %v1003_v43 = vpop.xlane.xlu1 %1002 }
 0x373   : > { %v997_v44 = vpop.xlane.xlu2 %996 }
 0x374   : > { %2658 = vrcp.f32 %v997_v44 }
 0x375   : > { %v2657_v45 = vpop.eup %2656  ;;  %2660 = vrcp.f32 %v1003_v43 }
 0x376   : > { %v1008_v42 = vmul.f32 %v2657_v45, %v988_v26 }
 0x377   : > { %v1000_v46 = vpop.xlane.xlu0 %999 }
 0x378   : > { %2662 = vrcp.f32 %v1000_v46  ;;  %2411 = vmatmul.msk.f32.vlgmr.msrb.gmra.mxu2 %vm875_vm6, %v1008_v42  ;;  %v1221_v46 = vperm.slane %v3104_v24, 2 }
 0x379   : > { %1183 = vmatpush.bf16.msrb.mxu2 %v1174_v59 }
 0x37a   : > { %v2659_v38 = vpop.eup %2658 }
 0x37b   : > { %v2661_v48 = vpop.eup %2660  ;;  %v1009_v49 = vmul.f32 %v2659_v38, %v989_v34  ;;  %v2531_v34 = vld [vmem:[%s3639_s3] sm:$0xff] }
 0x37c   : > { %v1011_v51 = vmul.f32 %v2661_v48, %v991_v29 }
 0x37d   : > { %2412 = vmatmul.msk.f32.vlgmr.msrb.gmra.mxu3 %vm875_vm6, %v1009_v49  ;;  %v1223_v49 = vperm.slane %v3104_v24, 3  ;;  %v2533_v24 = vld [vmem:[%s3640_s4] sm:$0xff] }
 0x37e   : > { %v2663_v50 = vpop.eup %2662  ;;  %1313 = vmatpush.bf16.msrb.mxu0 %v2533_v24 }
 0x37f   : > { %v1010_v52 = vmul.f32 %v2663_v50, %v990_v37 }
 0x380   : > { %2414 = vmatmul.msk.f32.vlgmr.msra.gmra.mxu2 %vm875_vm6, %v1011_v51 }
 0x381   : > { %2413 = vmatmul.msk.f32.vlgmr.msrb.gmra.mxu1 %vm875_vm6, %v1010_v52 }
 0x3fb   : > { %v1032_v60 = vpop.f32.mrf.mxu2 }
 0x3fc   : > { %v1104_v61 = vpack.c.bf16 %v1032_v60, %v1032_v60 }
 0x3fe   : > { %v1078_v62 = vpop.f32.mrf.mxu1  ;;  %2415 = vmatmul.msk.bf16.vlgmr.msra.gmra.mxu3 %vm875_vm6, %v1104_v61 }
 0x3ff   : > { %v1106_v63 = vpack.c.bf16 %v1078_v62, %v1078_v62 }
 0x400   : > { %v1055_v1 = vpop.f32.mrf.mxu3 }
 0x401   : > { %2417 = vmatmul.msk.bf16.vlgmr.msra.gmra.mxu1 %vm875_vm6, %v1106_v63  ;;  %v1105_v39 = vpack.c.bf16 %v1055_v1, %v1055_v1 }
 0x403   : > { %v1101_v2 = vpop.f32.mrf.mxu2  ;;  %2416 = vmatmul.msk.bf16.vlgmr.msra.gmra.mxu0 %vm875_vm6, %v1105_v39 }
 0x404   : > { %v1107_v3 = vpack.c.bf16 %v1101_v2, %v1101_v2 }
 0x406   : > { %2418 = vmatmul.msk.bf16.vlgmr.msrb.gmra.mxu2 %vm875_vm6, %v1107_v3 }
 0x47e   : > { %v1166_v19 = vpop.f32.mrf.mxu1 }
 0x47f   : > { %v1192_v23 = vsel %vm438_vm0, %v1166_v19, 0.0 }
 0x480   : > { %v1147_v5 = vpop.f32.mrf.mxu0 }
 0x481   : > { %v1128_v6 = vpop.f32.mrf.mxu3  ;;  %v1190_v7 = vsel %vm438_vm0, %v1147_v5, 0.0  ;;  %v1277_v5 = vperm.slane %v3109_v33, 3  ;;  %v2538_v33 = vld [vmem:[%s3637_s1 + $0x18] sm:$0xff] }
 0x482   : > { %v1189_v9 = vsel %vm438_vm0, %v1128_v6, 0.0  ;;  %1378 = vmatpush.bf16.msrb.mxu1 %v2538_v33 }
 0x483   : > { %v1191_v10 = vadd.f32 %v1190_v7, %v1189_v9 }
 0x485   : > { %v1193_v15 = vadd.f32 %v1192_v23, %v1191_v10 }
 0x486   : > { %v1168_v12 = vpop.f32.mrf.mxu1 }
 0x488   : > { %v1149_v13 = vpop.f32.mrf.mxu0 }
 0x489   : > { %v1130_v4 = vpop.f32.mrf.mxu3  ;;  %v1185_v14 = vpop.f32.mrf.mxu2 }
 0x48a   : > { %v1194_v16 = vsel %vm438_vm0, %v1185_v14, 0.0 }
 0x48b   : > { %v1195_v17 = vadd.f32 %v1194_v16, %v1193_v15  ;;  %v2537_v16 = vld [vmem:[%s3637_s1 + $0x10] sm:$0xff] }
 0x48c   : > { %1379 = vmatpush.bf16.msrb.mxu1 %v2537_v16 }
 0x48d   : > { %v1196_v21 = vadd.f32 %v1195_v17, %v3088_v0  ;;  %v2532_v0 = vld [vmem:[%s3639_s3 + $0x8] sm:$0xff] }
 0x48e   : > { %1252 = vmatpush.bf16.msrb.mxu3 %v2532_v0 }
 0x48f   : > { %v3311_v22 = vadd.f32 %v1197_v18, %v1196_v21 }
 0x491   : > { %v1187_v25 = vpop.f32.mrf.mxu2  ;;  %v1199_v26 = vsel %vm438_vm0, %v3311_v22, 0.0 }
 0x492   : > { %1200 = vadd.xlane.f32.xlu2 %v1199_v26  ;;  %1253 = vmatpush.bf16.msrb.mxu3 %v2531_v34 }
 0x505   : > { %v1201_v27 = vpop.xlane.xlu2 %1200 }
 0x506   : > { %v1202_v28 = vmul.f32 %v1201_v27, %v3092_v8 }
 0x508   : > { %v1203_v29 = vsub.f32 %v3311_v22, %v1202_v28  ;;  %v3358_v28 = vld [vmem:[#allocation7 + $0x4] sm:$0xf] }
 0x50a   : > { %v1204_v31 = vmul.f32 %v1203_v29, %v1203_v29 }
 0x50c   : > { %v1205_v32 = vsel %vm438_vm0, %v1204_v31, 0.0 }
 0x50d   : > { %1206 = vadd.xlane.f32.xlu1 %v1205_v32  ;;  %v1346_v32 = vperm.slane %v3358_v28, 0 }
 0x580   : > { %v1207_v35 = vpop.xlane.xlu1 %1206 }
 0x581   : > { %v1208_v30 = vmul.f32 %v1207_v35, %v3092_v8  ;;  %v1348_v35 = vperm.slane %v3358_v28, 1 }
 0x583   : > { %v1209_v37 = vadd.f32 1e-05, %v1208_v30 }
 0x585   : > { %2664 = vrsqrt.f32 %v1209_v37  ;;  %vm1216_vm10 = vweird.f32 %v1209_v37 }
 0x58b   : > { %v2665_v40 = vpop.eup %2664 }
 0x58c   : > { %v1211_v41 = vmul.f32 %v2665_v40, %v1209_v37  ;;  %vm1217_vm9 = vweird.f32 %v2665_v40 }
 0x58d   : > { %vm1218_vm11 = vmor %vm1216_vm10, %vm1217_vm9 }
 0x58e   : > { %v1212_v43 = vmul.f32 %v2665_v40, %v1211_v41  ;;  %v3363_v41 = vld [vmem:[#allocation5 + $0x4] sm:$0xf] }
 0x590   : > { %v1213_v44 = vmul.f32 0.5, %v1212_v43  ;;  %v1356_v43 = vperm.slane %v3363_v41, 0 }
 0x592   : > { %v1214_v45 = vsub.f32 1.5, %v1213_v44 }
 0x594   : > { %v1215_v42 = vmul.f32 %v2665_v40, %v1214_v45 }
 0x596   : > { %v1219_v38 = vsel %vm1218_vm11, %v2665_v40, %v1215_v42 }
 0x597   : > { %v1220_v48 = vmul.f32 %v1219_v38, %v1203_v29 }
 0x599   : > { %v1222_v50 = vmul.f32 %v1221_v46, %v1220_v48 }
 0x59b   : > { %v1224_v51 = vadd.f32 %v1223_v49, %v1222_v50 }
 0x59d   : > { %v1225_v52 = vpack.c.bf16 %v1224_v51, %v1224_v51 }
 0x59f   : > { %2427 = vmatmul.msk.bf16.vlgmr.msrb.gmra.mxu3 %vm438_vm0, %v1225_v52 }
 0x622   : > { %v1255_v57 = vpop.f32.mrf.mxu3 }
 0x623   : > { %v1256_v36 = vadd.f32 %v1255_v57, %v1230_v56 }
 0x625   : > { %v1260_v58 = vmul.f32 0.044715, %v1256_v36  ;;  %v1259_v39 = vmul.f32 0.5, %v1256_v36 }
 0x627   : > { %v1261_v59 = vmul.f32 %v1260_v58, %v1256_v36 }
 0x629   : > { %v1262_v60 = vmul.f32 %v1261_v59, %v1256_v36 }
 0x62a   : > { %v1257_v61 = vpop.f32.mrf.mxu3 }
 0x62b   : > { %v1263_v62 = vadd.f32 %v1262_v60, %v1256_v36 }
 0x62d   : > { %v1264_v63 = vmul.f32 0.7978845, %v1263_v62 }
 0x62f   : > { %2666 = vtanh.f32 %v1264_v63 }
 0x635   : > { %v2667_v1 = vpop.eup %2666 }
 0x636   : > { %v1266_v2 = vadd.f32 1.0, %v2667_v1 }
 0x638   : > { %v1267_v3 = vmul.f32 %v1266_v2, %v1259_v39 }
 0x63a   : > { %v1268_v19 = vpack.c.bf16 %v1267_v3, %v1267_v3 }
 0x63c   : > { %2444 = vmatmul.msk.bf16.vlgmr.msrb.gmra.mxu0 %vm1302_vm12, %v1268_v19 }
 0x6b9   : > { %v1315_v6 = vpop.f32.mrf.mxu0 }
 0x6ba   : > { %v1316_v7 = vadd.f32 %v1315_v6, %v1277_v5 }
 0x6bc   : > { %v3344_v9 = vadd.f32 %v1316_v7, %v3311_v22 }
 0x6be   : > { %v1324_v10 = vsel %vm438_vm0, %v3344_v9, 0.0 }
 0x6bf   : > { %1325 = vadd.xlane.f32.xlu0 %v1324_v10 }
 0x6c1   : > { %v1317_v12 = vpop.f32.mrf.mxu0 }
 0x732   : > { %v1326_v23 = vpop.xlane.xlu0 %1325 }
 0x733   : > { %v1327_v13 = vmul.f32 %v1326_v23, %v3092_v8 }
 0x735   : > { %v1328_v4 = vsub.f32 %v3344_v9, %v1327_v13 }
 0x737   : > { %v1329_v14 = vmul.f32 %v1328_v4, %v1328_v4 }
 0x739   : > { %v1330_v15 = vsel %vm438_vm0, %v1329_v14, 0.0 }
 0x73a   : > { %1331 = vadd.xlane.f32.xlu2 %v1330_v15 }
 0x7ad   : > { %v1332_v17 = vpop.xlane.xlu2 %1331 }
 0x7ae   : > { %v1333_v18 = vmul.f32 %v1332_v17, %v3092_v8 }
 0x7b0   : > { %v1334_v21 = vadd.f32 1e-05, %v1333_v18 }
 0x7b2   : > { %2668 = vrsqrt.f32 %v1334_v21  ;;  %vm1341_vm14 = vweird.f32 %v1334_v21 }
 0x7b8   : > { %v2669_v22 = vpop.eup %2668 }
 0x7b9   : > { %v1336_v25 = vmul.f32 %v2669_v22, %v1334_v21  ;;  %vm1342_vm13 = vweird.f32 %v2669_v22 }
 0x7ba   : > { %vm1343_vm15 = vmor %vm1341_vm14, %vm1342_vm13 }
 0x7bb   : > { %v1337_v26 = vmul.f32 %v2669_v22, %v1336_v25 }
 0x7bd   : > { %v1338_v27 = vmul.f32 0.5, %v1337_v26 }
 0x7bf   : > { %v1339_v29 = vsub.f32 1.5, %v1338_v27 }
 0x7c1   : > { %v1340_v31 = vmul.f32 %v2669_v22, %v1339_v29 }
 0x7c3   : > { %v1344_v0 = vsel %vm1343_vm15, %v2669_v22, %v1340_v31 }
 0x7c4   : > { %v1345_v34 = vmul.f32 %v1344_v0, %v1328_v4 }
 0x7c6   : > { %v1347_v30 = vmul.f32 %v1346_v32, %v1345_v34 }
 0x7c8   : > { %v1349_v37 = vadd.f32 %v1348_v35, %v1347_v30 }
 0x7ca   : > { %v1350_v40 = vpack.c.bf16 %v1349_v37, %v1349_v37 }
 0x7cc   : > { %2457 = vmatmul.msk.bf16.vlgmr.msrb.gmra.mxu1 %vm438_vm0, %v1350_v40 }
 0x849   : > { %v1381_v44 = vpop.f32.mrf.mxu1 }
 0x84a   : > { %v1382_v45 = vadd.f32 %v1381_v44, %v1356_v43 }
 0x84c   : > { %1398 = vrot.lane.b32.xlu2 %v1382_v45, %s2895_s29  ;;  %1392 = vrot.lane.b32.xlu0 %v1382_v45, %s2898_s12  ;;  %s3670_s29 = smov 56   ;;  %v1421_v55 = vrot.slane %v1382_v45, 4 }
 0x84d   : > { %1386 = vrot.lane.b32.xlu1 %v1382_v45, %s2896_s25 }
 0x851   : > { %v1383_v42 = vpop.f32.mrf.mxu1 }
 0x854   : > { %1404 = vrot.lane.b32.xlu2 %v1382_v45, %s2900_s24  ;;  %1389 = vrot.lane.b32.xlu0 %v1382_v45, %s2897_s18  ;;  %s3671_s18 = sshll.u32 %s3070_s30, 3 }
 0x855   : > { %1395 = vrot.lane.b32.xlu1 %v1382_v45, %s2894_s26  ;;  %s426_s12 = scalar_lea.vmem [#allocation10], %s3671_s18 }
 0x856   : > { %s2277_s24 = sshll.u32 %s426_s12, 4  ;;  %s2278_s24 = int_to_ptr.vmem [resolvable:$true] %s2277_s24 }
 0x85c   : > { %1407 = vrot.lane.b32.xlu2 %v1382_v45, %s3666_s19  ;;  %1401 = vrot.lane.b32.xlu0 %v1382_v45, %s3667_s22  ;;  %s2526_s22 = sshll.u32 %s2987_s20, 3 }
 0x85d   : > { %1413 = vrot.lane.b32.xlu1 %v1382_v45, %s3668_s17 }
 0x864   : > { %1416 = vrot.lane.b32.xlu0 %v1382_v45, %s3669_s8 }
 0x865   : > { %1410 = vrot.lane.b32.xlu1 %v1382_v45, %s3670_s29  ;;  %s2275_s29 = scalar_lea.hbm %s3646_s10, %s2526_s22  ;;  %s2832_s22 = scalar_lea.hbm %s3646_s10, 16 }
 0x866   : > { %s2279_s5 = sshll.u32 %s2275_s29, 4  ;;  %s2280_s5 = int_to_ptr.hbm [resolvable:$true] %s2279_s5 }
 0x867   : > { %s2826_s20 = sshra.s32 %s2280_s5, 4  ;;  %s2827_s20 = int_to_ptr.hbm [resolvable:$true] %s2826_s20 }
 0x868   : > { %s2828_s21 = scalar_lea.hbm %s2827_s20, 8  ;;  %p2833_p12 = scmp.lt.s32.totalorder %s2827_s20, %s3646_s10 }
 0x869   : > { %p2829_p1 = scmp.ne.s32.totalorder %s2827_s20, %s2828_s21  ;;  %p2834_p8 = scmp.lt.s32.totalorder %s2832_s22, %s2828_s21 }
 0x86b   : > { %p2830_p3 = pnand %p2829_p1, %p3039_p13  ;;  %p2835_p7 = por %p2834_p8, %p2833_p12 }
 0x86d   : > { %p2831_p5 = pneg %p2830_p3 }
 0x86f   : > { %p2836_p9 = pnand %p2835_p7, %p2831_p5 }
 0x8a6   : > { %v1399_v46 = vpop.permute.xlu2 %1398 }
 0x8a7   : > { %v1457_v24 = vrot.slane %v1399_v46, 4 }
 0x8ae   : > { %v1405_v50 = vpop.permute.xlu2 %1404 }
 0x8af   : > { %v1455_v56 = vrot.slane %v1405_v50, 4  ;;  %v1458_v61 = vsel %vm541_vm5, %v1405_v50, %v1457_v24 }
 0x8b0   : > { %v1466_v6 = vperm.slane %v1458_v61, %v3123_v47 }
 0x8b1   : > { %v1456_v39 = vsel %vm541_vm5, %v1455_v56, %v1399_v46 }
 0x8b2   : > { %v1462_v13 = vperm.slane %v1456_v39, %v3123_v47  ;;  %v1503_v18 = vrot.slane %v1466_v6, 4 }
 0x8b4   : > { %v1491_v32 = vrot.slane %v1462_v13, 4 }
 0x8b6   : > { %v1408_v2 = vpop.permute.xlu2 %1407 }
 0x8b7   : > { %v1533_v4 = vrot.slane %v1408_v2, 4 }
 0x8be   : > { %v1393_v38 = vpop.permute.xlu0 %1392 }
 0x8bf   : > { %v1431_v48 = vrot.slane %v1393_v38, 4  ;;  %v1387_v49 = vpop.permute.xlu1 %1386 }
 0x8c0   : > { %v1433_v51 = vrot.slane %v1387_v49, 4 }
 0x8c1   : > { %v1432_v53 = vsel %vm541_vm5, %v1431_v48, %v1387_v49 }
 0x8c2   : > { %v1434_v52 = vsel %vm541_vm5, %v1393_v38, %v1433_v51  ;;  %v1438_v57 = vperm.slane %v1432_v53, %v3123_v47 }
 0x8c3   : > { %v1442_v54 = vperm.slane %v1434_v52, %v3123_v47 }
 0x8c4   : > { %v1467_v3 = vrot.slane %v1438_v57, 4 }
 0x8c5   : > { %v1479_v63 = vrot.slane %v1442_v54, 4 }
 0x8c6   : > { %v1390_v36 = vpop.permute.xlu0 %1389 }
 0x8c7   : > { %v1419_v58 = vrot.slane %v1390_v36, 4  ;;  %v1422_v59 = vsel %vm541_vm5, %v1390_v36, %v1421_v55  ;;  %v1396_v60 = vpop.permute.xlu1 %1395 }
 0x8c8   : > { %v1430_v62 = vperm.slane %v1422_v59, %v3123_v47  ;;  %v1445_v16 = vrot.slane %v1396_v60, 4 }
 0x8c9   : > { %v1420_v1 = vsel %vm541_vm5, %v1419_v58, %v1382_v45 }
 0x8ca   : > { %v1426_v19 = vperm.slane %v1420_v1, %v3123_v47  ;;  %v1481_v5 = vrot.slane %v1430_v62, 4  ;;  %v1480_v7 = vsel %vm541_vm5, %v1479_v63, %v1430_v62 }
 0x8cb   : > { %v1486_v33 = vperm.slane %v1480_v7, %v3136_v11 }
 0x8cc   : > { %v1468_v10 = vsel %vm541_vm5, %v1467_v3, %v1426_v19  ;;  %v1469_v12 = vrot.slane %v1426_v19, 4  ;;  %v1482_v23 = vsel %vm541_vm5, %v1442_v54, %v1481_v5 }
 0x8cd   : > { %v1474_v15 = vperm.slane %v1468_v10, %v3136_v11  ;;  %v1490_v21 = vperm.slane %v1482_v23, %v3136_v11  ;;  %v1525_v37 = vrot.slane %v1486_v33, 4 }
 0x8ce   : > { %v1470_v14 = vsel %vm541_vm5, %v1438_v57, %v1469_v12  ;;  %v1402_v17 = vpop.permute.xlu0 %1401 }
 0x8cf   : > { %v1443_v22 = vrot.slane %v1402_v17, 4  ;;  %v1414_v25 = vpop.permute.xlu1 %1413  ;;  %v1478_v26 = vperm.slane %v1470_v14, %v3136_v11  ;;  %v1446_v27 = vsel %vm541_vm5, %v1402_v17, %v1445_v16  ;;  %v1517_v30 = vrot.slane %v1474_v15, 4 }
 0x8d0   : > { %v1531_v29 = vrot.slane %v1414_v25, 4  ;;  %v1534_v31 = vsel %vm541_vm5, %v1414_v25, %v1533_v4  ;;  %v1454_v34 = vperm.slane %v1446_v27, %v3123_v47  ;;  %v1529_v44 = vrot.slane %v1490_v21, 4 }
 0x8d1   : > { %v1444_v0 = vsel %vm541_vm5, %v1443_v22, %v1396_v60  ;;  %v3402_v35 = vperm.slane %v1534_v31, %v3123_v47  ;;  %v1521_v38 = vrot.slane %v1478_v26, 4 }
 0x8d2   : > { %v1450_v40 = vperm.slane %v1444_v0, %v3123_v47  ;;  %v1532_v43 = vsel %vm541_vm5, %v1531_v29, %v1408_v2  ;;  %v1504_v45 = vsel %vm541_vm5, %v1503_v18, %v1454_v34  ;;  %v1505_v42 = vrot.slane %v1454_v34, 4 }
 0x8d3   : > { %v1538_v46 = vperm.slane %v1532_v43, %v3123_v47  ;;  %v1510_v50 = vperm.slane %v1504_v45, %v3136_v11  ;;  %v1569_v54 = vrot.slane %v3402_v35, 4 }
 0x8d4   : > { %v1492_v48 = vsel %vm541_vm5, %v1491_v32, %v1450_v40  ;;  %v1493_v49 = vrot.slane %v1450_v40, 4  ;;  %v1506_v52 = vsel %vm541_vm5, %v1466_v6, %v1505_v42 }
 0x8d5   : > { %v1498_v51 = vperm.slane %v1492_v48, %v3136_v11  ;;  %v1557_v53 = vrot.slane %v1538_v46, 4  ;;  %v1514_v24 = vperm.slane %v1506_v52, %v3136_v11  ;;  %v1523_v56 = vrot.slane %v1510_v50, 4 }
 0x8d6   : > { %v1494_v55 = vsel %vm541_vm5, %v1462_v13, %v1493_v49  ;;  %v1526_v57 = vsel %vm541_vm5, %v1510_v50, %v1525_v37  ;;  %v1417_v39 = vpop.permute.xlu0 %1416 }
 0x8d7   : > { %v1502_v36 = vperm.slane %v1494_v55, %v3136_v11  ;;  %v1515_v58 = vrot.slane %v1498_v51, 4  ;;  %v3418_v59 = vsel %vm541_vm5, %v1498_v51, %v1517_v30  ;;  %v1625_v60 = vrot.slane %v1526_v57, 4  ;;  %v1411_v2 = vpop.permute.xlu1 %1410 }
 0x8d8   : > { %v1524_v61 = vsel %vm541_vm5, %v1523_v56, %v1486_v33  ;;  %v1527_v62 = vrot.slane %v1514_v24, 4  ;;  %v1530_v63 = vsel %vm541_vm5, %v1514_v24, %v1529_v44  ;;  %v1601_v1 = vrot.slane %v3418_v59, 4 }
 0x8d9   : > { %v1516_v3 = vsel %vm541_vm5, %v1515_v58, %v1474_v15  ;;  %v1519_v19 = vrot.slane %v1502_v36, 4  ;;  %v3425_v5 = vsel %vm541_vm5, %v1502_v36, %v1521_v38  ;;  %v1613_v6 = vrot.slane %v1524_v61, 4 }
 0x8da   : > { %v1528_v7 = vsel %vm541_vm5, %v1527_v62, %v1490_v21  ;;  %v1589_v10 = vrot.slane %v1516_v3, 4  ;;  %v1599_v12 = vrot.slane %v3425_v5, 4  ;;  %v1623_v23 = vrot.slane %v1530_v63, 4 }
 0x8db   : > { %v1611_v13 = vrot.slane %v1528_v7, 4  ;;  %v1626_v4 = vsel %vm541_vm5, %v1530_v63, %v1625_v60  ;;  %v1543_v14 = vrot.slane %v1417_v39, 4  ;;  %v1545_v33 = vrot.slane %v1411_v2, 4 }
 0x8dc   : > { %v1624_v16 = vsel %vm541_vm5, %v1623_v23, %v1526_v57  ;;  %v1634_v15 = vperm.slane %v1626_v4, %v3123_v47  ;;  %v1520_v17 = vsel %vm541_vm5, %v1519_v19, %v1478_v26  ;;  %v1602_v18 = vsel %vm541_vm5, %v3425_v5, %v1601_v1 }
 0x8dd   : > { %v1612_v21 = vsel %vm541_vm5, %v1611_v13, %v1524_v61  ;;  %v3437_v22 = vperm.slane %v1624_v16, %v3123_v47  ;;  %v1544_v25 = vsel %vm541_vm5, %v1543_v14, %v1411_v2  ;;  %v1546_v27 = vsel %vm541_vm5, %v1417_v39, %v1545_v33 }
 0x8de   : > { %v1550_v29 = vperm.slane %v1544_v25, %v3123_v47  ;;  %v1554_v31 = vperm.slane %v1546_v27, %v3123_v47  ;;  %v1587_v32 = vrot.slane %v1520_v17, 4  ;;  %v1590_v0 = vsel %vm541_vm5, %v1520_v17, %v1589_v10 }
 0x8df   : > { %v1598_v26 = vperm.slane %v1590_v0, %v3123_v47  ;;  %v1610_v34 = vperm.slane %v1602_v18, %v3123_v47  ;;  %v1614_v30 = vsel %vm541_vm5, %v1528_v7, %v1613_v6  ;;  %v1671_v37 = vrot.slane %v1634_v15, 4 }
 0x8e0   : > { %v1555_v40 = vrot.slane %v1550_v29, 4  ;;  %v1558_v43 = vsel %vm541_vm5, %v1550_v29, %v1557_v53  ;;  %v1567_v44 = vrot.slane %v1554_v31, 4  ;;  %v1570_v45 = vsel %vm541_vm5, %v1554_v31, %v1569_v54 }
 0x8e1   : > { %v1566_v42 = vperm.slane %v1558_v43, %v3136_v11  ;;  %v1578_v38 = vperm.slane %v1570_v45, %v3136_v11  ;;  %v1622_v48 = vperm.slane %v1614_v30, %v3123_v47  ;;  %v1647_v49 = vrot.slane %v1610_v34, 4 }
 0x8e2   : > { %v1556_v50 = vsel %vm541_vm5, %v1555_v40, %v1538_v46  ;;  %v1568_v51 = vsel %vm541_vm5, %v1567_v44, %v3402_v35  ;;  %v1649_v52 = vrot.slane %v1598_v26, 4  ;;  %v1588_v55 = vsel %vm541_vm5, %v1587_v32, %v1516_v3 }
 0x8e3   : > { %v1562_v53 = vperm.slane %v1556_v50, %v3136_v11  ;;  %v1574_v24 = vperm.slane %v1568_v51, %v3136_v11  ;;  %v1581_v54 = vrot.slane %v1566_v42, 4  ;;  %v1585_v56 = vrot.slane %v1578_v38, 4 }
 0x8e4   : > { %v1648_v57 = vsel %vm541_vm5, %v1647_v49, %v1598_v26  ;;  %v1672_v36 = vsel %vm541_vm5, %v1671_v37, %v1622_v48  ;;  %v1650_v58 = vsel %vm541_vm5, %v1610_v34, %v1649_v52  ;;  %v1673_v60 = vrot.slane %v1622_v48, 4 }
 0x8e5   : > { %v1579_v46 = vrot.slane %v1562_v53, 4  ;;  %v1582_v61 = vsel %vm541_vm5, 0.0, %v1581_v54  ;;  %v1583_v35 = vrot.slane %v1574_v24, 4  ;;  %v1586_v62 = vsel %vm541_vm5, 0.0, %v1585_v56 }
 0x8e6   : > { %v1699_v63 = vsel %vm541_vm5, %v1581_v54, %v1562_v53  ;;  %v1704_v1 = vrot.slane %v1582_v61, 4  ;;  %v1710_v39 = vsel %vm541_vm5, %v1585_v56, %v1574_v24  ;;  %v1715_v2 = vrot.slane %v1586_v62, 4 }
 0x8e7   : > { %v1580_v3 = vsel %vm541_vm5, 0.0, %v1579_v46  ;;  %v1703_v19 = vperm.slane %v1699_v63, %v3123_v47  ;;  %v1654_v5 = vperm.slane %v1648_v57, %v3136_v11  ;;  %v1678_v6 = vperm.slane %v1672_v36, %v3136_v11 }
 0x8e8   : > { %v1658_v7 = vperm.slane %v1650_v58, %v3136_v11  ;;  %v1674_v10 = vsel %vm541_vm5, %v1634_v15, %v1673_v60  ;;  %v1594_v23 = vperm.slane %v1588_v55, %v3123_v47  ;;  %v1600_v13 = vsel %vm541_vm5, %v1599_v12, %v3418_v59 }
 0x8e9   : > { %v1691_v4 = vrot.slane %v1678_v6, 4  ;;  %v1693_v14 = vrot.slane %v1654_v5, 4  ;;  %v1682_v33 = vperm.slane %v1674_v10, %v3136_v11  ;;  %v1606_v16 = vperm.slane %v1600_v13, %v3123_v47 }
 0x8ea   : > { %v1618_v17 = vperm.slane %v1612_v21, %v3123_v47  ;;  %v1659_v18 = vrot.slane %v3437_v22, 4  ;;  %v1697_v25 = vrot.slane %v1658_v7, 4  ;;  %v1637_v27 = vrot.slane %v1594_v23, 4 }
 0x8eb   : > { %v1692_v29 = vsel %vm541_vm5, %v1691_v4, %v1654_v5  ;;  %v1694_v15 = vsel %vm541_vm5, %v1678_v6, %v1693_v14  ;;  %v1695_v31 = vrot.slane %v1682_v33, 4  ;;  %v1635_v32 = vrot.slane %v1606_v16, 4 }
 0x8ec   : > { %2458 = vmatpush.xpose.msk.msra.mxu2 %vm875_vm6, %v1692_v29  ;;  %v1660_v59 = vsel %vm541_vm5, %v1659_v18, %v1618_v17  ;;  %v1698_v12 = vsel %vm541_vm5, %v1682_v33, %v1697_v25  ;;  %v1638_v0 = vsel %vm541_vm5, %v1606_v16, %v1637_v27  ;;  %v1661_v26 = vrot.slane %v1618_v17, 4 }
 0x8ed   : > { %v1696_v21 = vsel %vm541_vm5, %v1695_v31, %v1658_v7  ;;  %v1636_v34 = vsel %vm541_vm5, %v1635_v32, %v1594_v23  ;;  %v1666_v30 = vperm.slane %v1660_v59, %v3136_v11  ;;  %2464 = vmatpush.xpose.msk.msra.mxu0 %vm875_vm6, %v1698_v12  ;;  %v1584_v37 = vsel %vm541_vm5, 0.0, %v1583_v35 }
 0x8ee   : > { %2462 = vmatpush.xpose.msk.msra.mxu3 %vm875_vm6, %v1696_v21  ;;  %v1642_v40 = vperm.slane %v1636_v34, %v3136_v11  ;;  %v1646_v43 = vperm.slane %v1638_v0, %v3136_v11  ;;  %v1662_v44 = vsel %vm541_vm5, %v3437_v22, %v1661_v26  ;;  %v1705_v45 = vsel %vm541_vm5, %v1704_v1, %v1580_v3 }
 0x8ef   : > { %v1683_v42 = vrot.slane %v1666_v30, 4  ;;  %v1670_v38 = vperm.slane %v1662_v44, %v3136_v11  ;;  %v1709_v48 = vperm.slane %v1705_v45, %v3123_v47  ;;  %v1714_v49 = vperm.slane %v1710_v39, %v3123_v47 }
 0x8f0   : > { %2460 = vmatpush.xpose.msk.msrb.mxu2 %vm875_vm6, %v1694_v15  ;;  %v1689_v50 = vrot.slane %v1646_v43, 4  ;;  %v1716_v51 = vsel %vm541_vm5, %v1715_v2, %v1584_v37  ;;  %v1723_v52 = vrot.slane %v1703_v19, 4  ;;  %v1685_v62 = vrot.slane %v1642_v40, 4 }
 0x8f1   : > { %v1684_v55 = vsel %vm541_vm5, %v1683_v42, %v1642_v40  ;;  %v1687_v53 = vrot.slane %v1670_v38, 4  ;;  %v1720_v24 = vperm.slane %v1716_v51, %v3123_v47  ;;  %v1735_v54 = vrot.slane %v1714_v49, 4  ;;  %v2470_v51 = vld [vmem:[%s3638_s2 + $0x10] sm:$0xf] }
 0x8f2   : > { %2459 = vmatmul.msk.f32.vlgmr.msra.gmra.mxu2 %vm875_vm6, %v1684_v55  ;;  %v1690_v22 = vsel %vm541_vm5, %v1670_v38, %v1689_v50  ;;  %v1724_v56 = vsel %vm541_vm5, %v1709_v48, %v1723_v52  ;;  %v1721_v57 = vrot.slane %v1709_v48, 4  ;;  %v1686_v10 = vsel %vm541_vm5, %v1666_v30, %v1685_v62  ;;  %v2472_v55 = vld [vmem:[%s3638_s2 + $0x18] sm:$0xf] }
 0x8f3   : > { %v1688_v36 = vsel %vm541_vm5, %v1687_v53, %v1646_v43  ;;  %2465 = vmatmul.msk.f32.vlgmr.msra.gmra.mxu0 %vm875_vm6, %v1690_v22  ;;  %v1732_v58 = vperm.slane %v1724_v56, %v3136_v11  ;;  %v1736_v60 = vsel %vm541_vm5, %v1720_v24, %v1735_v54  ;;  %v1733_v46 = vrot.slane %v1720_v24, 4  ;;  %v2471_v24 = vld [vmem:[%s3638_s2 + $0x14] sm:$0xf]  ;;  %v2473_v22 = vld [vmem:[%s3638_s2 + $0x1c] sm:$0xf] }
 0x8f4   : > { %2463 = vmatmul.msk.f32.vlgmr.msra.gmra.mxu3 %vm875_vm6, %v1688_v36  ;;  %v1744_v47 = vperm.slane %v1736_v60, %v3136_v11  ;;  %v1722_v61 = vsel %vm541_vm5, %v1721_v57, %v1703_v19  ;;  %v1994_v52 = vsel %vm1115_vm8, %v2470_v51, 0  ;;  %v2032_v53 = vsel %vm1115_vm8, %v2472_v55, 0 }
 0x8f5   : > { %v1751_v35 = vrot.slane %v1732_v58, 4  ;;  %v1728_v63 = vperm.slane %v1722_v61, %v3136_v11  ;;  %v1734_v1 = vsel %vm541_vm5, %v1733_v46, %v1714_v49  ;;  %v2013_v54 = vsel %vm1115_vm8, %v2471_v24, 0 }
 0x8f6   : > { %v1749_v39 = vrot.slane %v1744_v47, 4  ;;  %v1740_v2 = vperm.slane %v1734_v1, %v3136_v11  ;;  %v2051_v56 = vsel %vm1115_vm8, %v2473_v22, 0  ;;  %v2108_v51 = vperm.slane %v3363_v41, 2 }
 0x8f7   : > { %v1752_v3 = vsel %vm541_vm5, %v1744_v47, %v1751_v35  ;;  %v1747_v5 = vrot.slane %v1728_v63, 4 }
 0x8f8   : > { %v1750_v6 = vsel %vm541_vm5, %v1749_v39, %v1732_v58  ;;  %1976 = vmatpush.msrb.mxu0 %v1752_v3  ;;  %v1745_v7 = vrot.slane %v1740_v2, 4 }
 0x8f9   : > { %1953 = vmatpush.msrb.mxu3 %v1750_v6  ;;  %v1748_v19 = vsel %vm541_vm5, %v1740_v2, %v1747_v5 }
 0x8fa   : > { %2461 = vmatmul.msk.f32.vlgmr.msrb.gmra.mxu2 %vm875_vm6, %v1686_v10  ;;  %v1746_v23 = vsel %vm541_vm5, %v1745_v7, %v1728_v63  ;;  %2060 = vmatpush.bf16.msra.mxu0 %v2051_v56 }
 0x8fb   : > { %1907 = vmatpush.msra.mxu1 %v1746_v23  ;;  %1930 = vmatpush.msra.mxu2 %v1748_v19 }
 0x8fc   : > { %2041 = vmatpush.bf16.msra.mxu3 %v2032_v53 }
 0x8fd   : > { %2003 = vmatpush.bf16.msrb.mxu1 %v1994_v52  ;;  %2022 = vmatpush.bf16.msrb.mxu2 %v2013_v54 }
 0x970   : > { %v1854_v33 = vpop.f32.mrf.mxu0 }
 0x971   : > { %v1863_v29 = vmul.f32 1.442695, %v1854_v33 }
 0x975   : > { %v1776_v13 = vpop.f32.mrf.mxu2 }
 0x976   : > { %v1857_v11 = vmul.f32 1.442695, %v1776_v13 }
 0x977   : > { %v1828_v4 = vpop.f32.mrf.mxu3 }
 0x978   : > { %2670 = vpow2.f32 %v1857_v11  ;;  %v1861_v14 = vmul.f32 1.442695, %v1828_v4  ;;  %v2074_v4 = vperm.slane %v3363_v41, 1 }
 0x97a   : > { %2672 = vpow2.f32 %v1861_v14 }
 0x97d   : > { %v1802_v16 = vpop.f32.mrf.mxu2 }
 0x97e   : > { %v2671_v17 = vpop.eup %2670  ;;  %v1859_v18 = vmul.f32 1.442695, %v1802_v16 }
 0x97f   : > { %v1865_v25 = vmul.f32 %v2671_v17, %v3271_v20 }
 0x980   : > { %v2673_v27 = vpop.eup %2672  ;;  %2674 = vpow2.f32 %v1859_v18 }
 0x981   : > { %v1869_v15 = vsel %vm875_vm6, %v1865_v25, 0.0  ;;  %v1867_v31 = vmul.f32 %v2673_v27, %v3271_v20  ;;  %2676 = vpow2.f32 %v1863_v29 }
 0x982   : > { %1870 = vadd.xlane.f32.xlu1 %v1869_v15 }
 0x983   : > { %v1875_v32 = vsel %vm875_vm6, %v1867_v31, 0.0 }
 0x984   : > { %1876 = vadd.xlane.f32.xlu0 %v1875_v32 }
 0x986   : > { %v2675_v59 = vpop.eup %2674 }
 0x987   : > { %v1866_v12 = vmul.f32 %v2675_v59, %v3271_v20  ;;  %v2677_v26 = vpop.eup %2676 }
 0x988   : > { %v1868_v21 = vmul.f32 %v2677_v26, %v3271_v20 }
 0x989   : > { %v1872_v0 = vsel %vm875_vm6, %v1866_v12, 0.0 }
 0x98a   : > { %1873 = vadd.xlane.f32.xlu2 %v1872_v0  ;;  %v1878_v34 = vsel %vm875_vm6, %v1868_v21, 0.0 }
 0x992   : > { %1879 = vadd.xlane.f32.xlu2 %v1878_v34 }
 0x9f5   : > { %v1871_v30 = vpop.xlane.xlu1 %1870 }
 0x9f6   : > { %2678 = vrcp.f32 %v1871_v30 }
 0x9f7   : > { %v1877_v37 = vpop.xlane.xlu0 %1876 }
 0x9f8   : > { %2680 = vrcp.f32 %v1877_v37 }
 0x9fc   : > { %v2679_v40 = vpop.eup %2678 }
 0x9fd   : > { %v1885_v43 = vmul.f32 %v2679_v40, %v1865_v25  ;;  %v1874_v44 = vpop.xlane.xlu2 %1873  ;;  %v2098_v40 = vperm.slane %v3358_v28, 2 }
 0x9fe   : > { %v2681_v45 = vpop.eup %2680  ;;  %2682 = vrcp.f32 %v1874_v44 }
 0x9ff   : > { %v1887_v42 = vmul.f32 %v2681_v45, %v1867_v31  ;;  %2466 = vmatmul.msk.f32.vlgmr.msra.gmra.mxu1 %vm875_vm6, %v1885_v43  ;;  %v2540_v31 = vld [vmem:[%s3639_s3 + $0x18] sm:$0xff]  ;;  %v2100_v45 = vperm.slane %v3358_v28, 3  ;;  %v2541_v28 = vld [vmem:[%s3640_s4 + $0x20] sm:$0xff] }
 0xa00   : > { %2130 = vmatpush.bf16.msra.mxu1 %v2540_v31 }
 0xa01   : > { %2468 = vmatmul.msk.f32.vlgmr.msrb.gmra.mxu3 %vm875_vm6, %v1887_v42 }
 0xa04   : > { %v2683_v38 = vpop.eup %2682 }
 0xa05   : > { %v1886_v48 = vmul.f32 %v2683_v38, %v1866_v12  ;;  %v1880_v20 = vpop.xlane.xlu2 %1879 }
 0xa06   : > { %2684 = vrcp.f32 %v1880_v20  ;;  %v2544_v20 = vld [vmem:[%s3640_s4 + $0x38] sm:$0xff] }
 0xa07   : > { %2467 = vmatmul.msk.f32.vlgmr.msra.gmra.mxu2 %vm875_vm6, %v1886_v48 }
 0xa08   : > { %2188 = vmatpush.bf16.msra.mxu2 %v2544_v20 }
 0xa0c   : > { %v2685_v49 = vpop.eup %2684 }
 0xa0d   : > { %v1888_v50 = vmul.f32 %v2685_v49, %v1868_v21  ;;  %v2543_v49 = vld [vmem:[%s3640_s4 + $0x30] sm:$0xff] }
 0xa0e   : > { %2189 = vmatpush.bf16.msra.mxu2 %v2543_v49 }
 0xa0f   : > { %2469 = vmatmul.msk.f32.vlgmr.msrb.gmra.mxu0 %vm875_vm6, %v1888_v50  ;;  %v2542_v50 = vld [vmem:[%s3640_s4 + $0x28] sm:$0xff] }
 0xa12   : > { %2190 = vmatpush.bf16.msra.mxu2 %v2542_v50 }
 0xa16   : > { %2191 = vmatpush.bf16.msra.mxu2 %v2541_v28 }
 0xa7c   : > { %v1909_v57 = vpop.f32.mrf.mxu1 }
 0xa7d   : > { %v1981_v36 = vpack.c.bf16 %v1909_v57, %v1909_v57 }
 0xa7f   : > { %2474 = vmatmul.msk.bf16.vlgmr.msrb.gmra.mxu1 %vm875_vm6, %v1981_v36 }
 0xa84   : > { %v1955_v58 = vpop.f32.mrf.mxu3 }
 0xa85   : > { %v1983_v60 = vpack.c.bf16 %v1955_v58, %v1955_v58 }
 0xa87   : > { %2476 = vmatmul.msk.bf16.vlgmr.msra.gmra.mxu3 %vm875_vm6, %v1983_v60 }
 0xa8a   : > { %v1932_v46 = vpop.f32.mrf.mxu2 }
 0xa8b   : > { %v1982_v47 = vpack.c.bf16 %v1932_v46, %v1932_v46 }
 0xa8c   : > { %v1978_v61 = vpop.f32.mrf.mxu0 }
 0xa8d   : > { %v1984_v35 = vpack.c.bf16 %v1978_v61, %v1978_v61  ;;  %2475 = vmatmul.msk.bf16.vlgmr.msrb.gmra.mxu2 %vm875_vm6, %v1982_v47  ;;  %v2156_v61 = vperm.slane %v3363_v41, 3 }
 0xa8f   : > { %2477 = vmatmul.msk.bf16.vlgmr.msra.gmra.mxu0 %vm875_vm6, %v1984_v35 }
 0xafc   : > { %v2005_v62 = vpop.f32.mrf.mxu1 }
 0xafd   : > { %v2066_v3 = vsel %vm438_vm0, %v2005_v62, 0.0 }
 0xb04   : > { %v2007_v63 = vpop.f32.mrf.mxu1 }
 0xb0a   : > { %v2043_v1 = vpop.f32.mrf.mxu3 }
 0xb0b   : > { %v2069_v10 = vsel %vm438_vm0, %v2043_v1, 0.0 }
 0xb0c   : > { %v2062_v39 = vpop.f32.mrf.mxu0 }
 0xb0d   : > { %v2071_v13 = vsel %vm438_vm0, %v2062_v39, 0.0 }
 0xb10   : > { %v2024_v2 = vpop.f32.mrf.mxu2 }
 0xb11   : > { %v2067_v5 = vsel %vm438_vm0, %v2024_v2, 0.0 }
 0xb12   : > { %v2068_v6 = vadd.f32 %v2067_v5, %v2066_v3  ;;  %v2045_v7 = vpop.f32.mrf.mxu3 }
 0xb14   : > { %v2070_v19 = vadd.f32 %v2069_v10, %v2068_v6  ;;  %v2064_v23 = vpop.f32.mrf.mxu0  ;;  %v2546_v10 = vld [vmem:[#allocation8 + $0x8] sm:$0xff] }
 0xb15   : > { %2256 = vmatpush.bf16.msrb.mxu3 %v2546_v10 }
 0xb16   : > { %v2072_v11 = vadd.f32 %v2071_v13, %v2070_v19  ;;  %v2545_v19 = vld [vmem:[#allocation8] sm:$0xff] }
 0xb18   : > { %v2026_v14 = vpop.f32.mrf.mxu2  ;;  %v2073_v33 = vadd.f32 %v2072_v11, %v3344_v9  ;;  %v2539_v9 = vld [vmem:[%s3639_s3 + $0x10] sm:$0xff] }
 0xb19   : > { %2131 = vmatpush.bf16.msra.mxu1 %v2539_v9  ;;  %2257 = vmatpush.bf16.msrb.mxu3 %v2545_v19  ;;  %v2643_v9 = vld [vmem:[%s3645_s9] ss:$0 sm:$0xff] }
 0xb1a   : > { %v2075_v16 = vadd.f32 %v2074_v4, %v2073_v33 }
 0xb1c   : > { %v2076_v17 = vsel %vm438_vm0, %v2075_v16, 0.0 }
 0xb1d   : > { %2077 = vadd.xlane.f32.xlu0 %v2076_v17 }
 0xb90   : > { %v2078_v18 = vpop.xlane.xlu0 %2077 }
 0xb91   : > { %v2079_v25 = vmul.f32 %v2078_v18, %v3092_v8  ;;  %v2641_v18 = vld [vmem:[%s3643_s7] ss:$0 sm:$0xff] }
 0xb93   : > { %v2080_v27 = vsub.f32 %v2075_v16, %v2079_v25 }
 0xb95   : > { %v2081_v29 = vmul.f32 %v2080_v27, %v2080_v27 }
 0xb97   : > { %v2082_v15 = vsel %vm438_vm0, %v2081_v29, 0.0 }
 0xb98   : > { %2083 = vadd.xlane.f32.xlu1 %v2082_v15 }
 0xc0b   : > { %v2084_v32 = vpop.xlane.xlu1 %2083 }
 0xc0c   : > { %v2085_v59 = vmul.f32 %v2084_v32, %v3092_v8 }
 0xc0e   : > { %v2086_v12 = vadd.f32 1e-05, %v2085_v59 }
 0xc10   : > { %2686 = vrsqrt.f32 %v2086_v12  ;;  %vm2093_vm2 = vweird.f32 %v2086_v12 }
 0xc16   : > { %v2687_v0 = vpop.eup %2686 }
 0xc17   : > { %v2088_v26 = vmul.f32 %v2687_v0, %v2086_v12  ;;  %vm2094_vm1 = vweird.f32 %v2687_v0 }
 0xc18   : > { %vm2095_vm3 = vmor %vm2093_vm2, %vm2094_vm1 }
 0xc19   : > { %v2089_v21 = vmul.f32 %v2687_v0, %v2088_v26 }
 0xc1b   : > { %v2090_v34 = vmul.f32 0.5, %v2089_v21 }
 0xc1d   : > { %v2091_v30 = vsub.f32 1.5, %v2090_v34 }
 0xc1f   : > { %v2092_v37 = vmul.f32 %v2687_v0, %v2091_v30 }
 0xc21   : > { %v2096_v43 = vsel %vm2095_vm3, %v2687_v0, %v2092_v37 }
 0xc22   : > { %v2097_v44 = vmul.f32 %v2096_v43, %v2080_v27 }
 0xc24   : > { %v2099_v42 = vmul.f32 %v2098_v40, %v2097_v44 }
 0xc26   : > { %v2101_v38 = vadd.f32 %v2100_v45, %v2099_v42 }
 0xc28   : > { %v2102_v48 = vpack.c.bf16 %v2101_v38, %v2101_v38 }
 0xc2a   : > { %2490 = vmatmul.msk.bf16.vlgmr.msra.gmra.mxu1 %vm438_vm0, %v2102_v48 }
 0xca7   : > { %v2133_v52 = vpop.f32.mrf.mxu1 }
 0xca8   : > { %v2134_v55 = vadd.f32 %v2133_v52, %v2108_v51 }
 0xcaa   : > { %v2138_v53 = vmul.f32 0.044715, %v2134_v55  ;;  %v2137_v58 = vmul.f32 0.5, %v2134_v55 }
 0xcac   : > { %v2139_v24 = vmul.f32 %v2138_v53, %v2134_v55 }
 0xcae   : > { %v2140_v54 = vmul.f32 %v2139_v24, %v2134_v55 }
 0xcaf   : > { %v2135_v22 = vpop.f32.mrf.mxu1 }
 0xcb0   : > { %v2141_v56 = vadd.f32 %v2140_v54, %v2134_v55 }
 0xcb2   : > { %v2142_v57 = vmul.f32 0.7978845, %v2141_v56 }
 0xcb4   : > { %2688 = vtanh.f32 %v2142_v57 }
 0xcba   : > { %v2689_v36 = vpop.eup %2688 }
 0xcbb   : > { %v2144_v60 = vadd.f32 1.0, %v2689_v36 }
 0xcbd   : > { %v2145_v46 = vmul.f32 %v2144_v60, %v2137_v58 }
 0xcbf   : > { %v2146_v47 = vpack.c.bf16 %v2145_v46, %v2145_v46 }
 0xcc1   : > { %2515 = vmatmul.msk.bf16.vlgmr.msra.gmra.mxu2 %vm1302_vm12, %v2146_v47 }
 0xd44   : > { %v2193_v35 = vpop.f32.mrf.mxu2 }
 0xd45   : > { %v2194_v62 = vadd.f32 %v2193_v35, %v2156_v61 }
 0xd47   : > { %v2197_v63 = vadd.f32 %v2194_v62, %v2075_v16 }
 0xd49   : > { %v2200_v1 = vsel %vm438_vm0, %v2197_v63, 0.0 }
 0xd4a   : > { %2201 = vadd.xlane.f32.xlu2 %v2200_v1 }
 0xd4c   : > { %v2195_v39 = vpop.f32.mrf.mxu2 }
 0xdbd   : > { %v2202_v2 = vpop.xlane.xlu2 %2201 }
 0xdbe   : > { %v2203_v3 = vmul.f32 %v2202_v2, %v3092_v8 }
 0xdc0   : > { %v2204_v5 = vsub.f32 %v2197_v63, %v2203_v3 }
 0xdc2   : > { %v2205_v6 = vmul.f32 %v2204_v5, %v2204_v5 }
 0xdc4   : > { %v2206_v7 = vsel %vm438_vm0, %v2205_v6, 0.0 }
 0xdc5   : > { %2207 = vadd.xlane.f32.xlu0 %v2206_v7 }
 0xe38   : > { %v2208_v41 = vpop.xlane.xlu0 %2207 }
 0xe39   : > { %v2209_v23 = vmul.f32 %v2208_v41, %v3092_v8  ;;  %v2642_v8 = vld [vmem:[%s3643_s7 + $0x1] ss:$0 sm:$0xff] }
 0xe3b   : > { %v2210_v13 = vadd.f32 1e-05, %v2209_v23 }
 0xe3d   : > { %2690 = vrsqrt.f32 %v2210_v13  ;;  %vm2217_vm5 = vweird.f32 %v2210_v13 }
 0xe43   : > { %v2691_v11 = vpop.eup %2690 }
 0xe44   : > { %v2212_v4 = vmul.f32 %v2691_v11, %v2210_v13  ;;  %vm2218_vm4 = vweird.f32 %v2691_v11 }
 0xe45   : > { %vm2219_vm6 = vmor %vm2217_vm5, %vm2218_vm4 }
 0xe46   : > { %v2213_v14 = vmul.f32 %v2691_v11, %v2212_v4 }
 0xe48   : > { %v2214_v33 = vmul.f32 0.5, %v2213_v14 }
 0xe4a   : > { %v2215_v16 = vsub.f32 1.5, %v2214_v33 }
 0xe4c   : > { %v2216_v17 = vmul.f32 %v2691_v11, %v2215_v16 }
 0xe4e   : > { %v2220_v25 = vsel %vm2219_vm6, %v2691_v11, %v2216_v17 }
 0xe4f   : > { %v2221_v27 = vmul.f32 %v2220_v25, %v2204_v5 }
 0xe51   : > { %v2223_v29 = vmul.f32 %v2641_v18, %v2221_v27 }
 0xe53   : > { %v2225_v15 = vadd.f32 %v2642_v8, %v2223_v29 }
 0xe55   : > { %v2226_v31 = vpack.c.bf16 %v2225_v15, %v2225_v15 }
 0xe57   : > { %2524 = vmatmul.msk.bf16.vlgmr.msrb.gmra.mxu3 %vm438_vm0, %v2226_v31 }
 0xeda   : > { %v2259_v32 = vpop.f32.mrf.mxu3 }
 0xedb   : > { %v2260_v59 = vadd.f32 %v2643_v9, %v2259_v32 }
 0xedd   : > { %2263 = vst [vmem:[%s426_s12] sm:$0xff] %v2260_v59 }
 0xede   : > { %2839 = shalt.err (!%p2836_p9)
}
 0xedf   : > { %2561 = dma.vmem_to_hbm [thread:$0]  (%p3039_p13), %s2278_s24, 128, %s2280_s5, %s2265_s6  }
 0xee2   : > { %v2261_v12 = vpop.f32.mrf.mxu3 }
 0xee3 PF: > { %s2291_s30 = sand.u32 1, %s2874_s13   ;;  %p3672_p10 = scmp.ge.s32.totalorder %s2886_s16, 2 }
 0xee4   : > { %s2292_s29 = scalar_lea.sflag [#allocation4], %s2291_s30 }
 0xee5   : > { %p2578_p11 = pnand %p3672_p10, %p3044_p4 }
 0xee7   : > { %p2579_p0 = pneg %p2578_p11 }
 0xee9   : > { %2869 = dma.done.wait (%p2579_p0), %s2292_s29, 128  }
 0xeea   : > { %2871 = vsyncadd (%p2579_p0), %s2292_s29, 4294967168  ;;  %s3673_s26 = sld [smem:[#allocation15_spill]]  ;;  %p25_p2 = scmp.ge.s32.totalorder %s3019_s28, 4  }
 0xeeb   : > { %s3674_s13 = smov %s2878_s14  ;;  %s3675_s14 = smov %s2882_s15 }
 0xeec   : > { %s3677_s16 = smov %s3019_s28  ;;  %27 = sbr.rel (!%p25_p2) target bundleno = 11 (0xb), region = 123 }
 0xef0   : > { %s3676_s15 = smov %s3673_s26 }
 0xef1   :  { %2298 = vsyncpa [#allocation3], 1 }
 0xef2   :  { %2300 = vsyncpa [#allocation3 + $0x1], 1 }
 0xef3   :  { %2301 = vsyncpa [#allocation6], 1 }
 0xef4   :  { %2302 = vsyncpa [#allocation9], 1 }
 0xef5   :  { %2303 = vsyncpa [#allocation4], 1 }
 0xef6   :  { %2305 = vsyncpa [#allocation4 + $0x1], 1 }

</bundles_post_ra>
